<compile_context>
chip_gen: v7x
topology: tpu7x:2x2x1
jax: 0.10.0
libtpu: 0.0.40
codegen_flags: <defaults>
</compile_context>

<pallas_src>
import jax
import jax.numpy as jnp
from jax.experimental import pallas as pl


# ---------------------------------------------------------------------------
# Pallas kernels
# ---------------------------------------------------------------------------
def _conv_pool_kernel(p0_ref, p1_ref, p2_ref, p3_ref, w_ref, b_ref, o_ref):
    """Fused 3x3 conv (im2col matmul) + bias + ReLU + 2x2/stride-2 max-pool.

    p{t}_ref : (Mp, K) bf16   im2col patches for pooling tap t = (dh, dw)
    w_ref    : (K, Cout) bf16
    b_ref    : (1, Cout) f32
    o_ref    : (Mp, Cout) bf16  pooled activation (Mp = B * Hp * Wp)

    Uses max_t relu(a_t + b) == relu(max_t a_t + b) (per-channel bias, relu is
    monotone), so the 4 taps are reduced on the f32 accumulator and the
    bias/ReLU epilogue runs once, in f32.
    """
    w = w_ref[...]
    acc = jnp.dot(p0_ref[...], w, preferred_element_type=jnp.float32)
    acc = jnp.maximum(acc, jnp.dot(p1_ref[...], w, preferred_element_type=jnp.float32))
    acc = jnp.maximum(acc, jnp.dot(p2_ref[...], w, preferred_element_type=jnp.float32))
    acc = jnp.maximum(acc, jnp.dot(p3_ref[...], w, preferred_element_type=jnp.float32))
    o_ref[...] = jnp.maximum(acc + b_ref[...], 0.0).astype(o_ref.dtype)


def conv3x3_relu_pool(tap_patches, w_mat, b):
    """tap_patches: 4 x (Mp, K) bf16; w_mat: (K, Cout) bf16; b: (1, Cout) f32."""
    Mp, K = tap_patches[0].shape
    Cout = w_mat.shape[1]
    full2d = lambda shape: pl.BlockSpec(shape, lambda: (0, 0))
    return pl.pallas_call(
        _conv_pool_kernel,
        out_shape=jax.ShapeDtypeStruct((Mp, Cout), jnp.bfloat16),
        in_specs=[full2d((Mp, K))] * 4 + [full2d((K, Cout)), full2d((1, Cout))],
        out_specs=full2d((Mp, Cout)),
    )(*tap_patches, w_mat, b)


def _fc_fused_kernel(x_ref, w1_ref, b1_ref, w2_ref, b2_ref, o_ref):
    """o = relu(x @ w1 + b1) @ w2 + b2; the hidden activation stays on-chip."""
    h = jnp.dot(x_ref[...], w1_ref[...], preferred_element_type=jnp.float32)
    h = jnp.maximum(h + b1_ref[...], 0.0)
    out = jnp.dot(h.astype(jnp.bfloat16), w2_ref[...],
                  preferred_element_type=jnp.float32)
    o_ref[...] = (out + b2_ref[...]).astype(o_ref.dtype)


def fc_fused(x, w1, b1, w2, b2):
    B, K1 = x.shape
    N1 = w1.shape[1]
    N2 = w2.shape[1]
    full2d = lambda shape: pl.BlockSpec(shape, lambda: (0, 0))
    return pl.pallas_call(
        _fc_fused_kernel,
        out_shape=jax.ShapeDtypeStruct((B, N2), jnp.float32),
        in_specs=[full2d((B, K1)), full2d((K1, N1)), full2d((1, N1)),
                  full2d((N1, N2)), full2d((1, N2))],
        out_specs=full2d((B, N2)),
    )(x, w1, b1, w2, b2)


# ---------------------------------------------------------------------------
# XLA glue: im2col patches grouped by 2x2-pool tap (layout only, no compute)
# ---------------------------------------------------------------------------
def _pool_tap_patches(x_nhwc, Hp, Wp):
    """Return 4 im2col matrices, one per pool tap (dh, dw), K order (kh, kw, cin).

    tap (dh, dw), row (b, ho, wo), col (kh, kw, cin) =
        x[b, 2*ho + dh + kh, 2*wo + dw + kw, cin]
    Floor-pool semantics fall out automatically (extra conv rows/cols unused).
    """
    B, H, W, C = x_nhwc.shape
    taps = []
    for dh in (0, 1):
        for dw in (0, 1):
            cols = []
            for kh in range(3):
                for kw in range(3):
                    r0, c0 = dh + kh, dw + kw
                    cols.append(x_nhwc[:, r0:r0 + 2 * Hp - 1:2,
                                       c0:c0 + 2 * Wp - 1:2, :])
            p = jnp.stack(cols, axis=3)                     # (B, Hp, Wp, 9, C)
            taps.append(p.reshape(B * Hp * Wp, 9 * C).astype(jnp.bfloat16))
    return taps


# ---------------------------------------------------------------------------
# Parameters
# ---------------------------------------------------------------------------
def init_params(key):
    """Random parameters in the PyTorch layouts (OIHW conv, (out,in) linear)."""
    ks = jax.random.split(key, 8)
    s = 0.05
    return {
        "conv1_w": s * jax.random.normal(ks[0], (32, 1, 3, 3), jnp.float32),
        "conv1_b": s * jax.random.normal(ks[1], (32,), jnp.float32),
        "conv2_w": s * jax.random.normal(ks[2], (64, 32, 3, 3), jnp.float32),
        "conv2_b": s * jax.random.normal(ks[3], (64,), jnp.float32),
        "fc1_w": s * jax.random.normal(ks[4], (128, 64 * 5 * 5), jnp.float32),
        "fc1_b": s * jax.random.normal(ks[5], (128,), jnp.float32),
        "fc2_w": s * jax.random.normal(ks[6], (10, 128), jnp.float32),
        "fc2_b": s * jax.random.normal(ks[7], (10,), jnp.float32),
    }


def pack_params(p):
    """One-time repack into kernel-ready layouts (bf16 MXU operands, f32 biases).

    * conv weights: OIHW -> (kh*kw*cin, cout), matching the im2col column order.
    * fc1 weight: columns permuted from PyTorch's (c, h, w) flatten order to the
      (h, w, c) order produced by the NHWC pooled activation, then transposed,
      so no activation transpose is needed inside the forward pass.
    * fc2 weight: pre-transposed to (128, 10).
    """
    def conv_mat(w):  # (Cout, Cin, 3, 3) -> (9*Cin, Cout)
        cout, cin = w.shape[0], w.shape[1]
        return (jnp.transpose(w, (2, 3, 1, 0))
                .reshape(9 * cin, cout).astype(jnp.bfloat16))

    fc1_hwc = (p["fc1_w"].reshape(128, 64, 5, 5)
               .transpose(0, 2, 3, 1).reshape(128, 64 * 5 * 5))
    return {
        "c1_w": conv_mat(p["conv1_w"]), "c1_b": p["conv1_b"].reshape(1, 32),
        "c2_w": conv_mat(p["conv2_w"]), "c2_b": p["conv2_b"].reshape(1, 64),
        "fc1_w": fc1_hwc.T.astype(jnp.bfloat16),
        "fc1_b": p["fc1_b"].reshape(1, 128),
        "fc2_w": p["fc2_w"].T.astype(jnp.bfloat16),
        "fc2_b": p["fc2_b"].reshape(1, 10),
    }


# ---------------------------------------------------------------------------
# Forward (matches the PyTorch module)
# ---------------------------------------------------------------------------
@jax.jit
def net_forward(kp, x_nchw):
    B = x_nchw.shape[0]
    # Cin == 1, so NCHW -> NHWC is a free reshape.
    x = x_nchw.reshape(B, 28, 28, 1)

    # conv1 (1->32) + ReLU + 2x2 max-pool, fused in one Pallas kernel.
    # TODO(synk): conv1's (B*169,9)x(9,32) matmul barely uses the MXU; kept on
    # the MXU since the network is launch-bound, not compute-bound, at this size.
    taps = _pool_tap_patches(x, 13, 13)                    # 4 x (B*169, 9) bf16
    x = conv3x3_relu_pool(taps, kp["c1_w"], kp["c1_b"])    # (B*169, 32) bf16
    x = x.reshape(B, 13, 13, 32)

    # conv2 (32->64) + ReLU + 2x2 max-pool (floor: conv row/col 10 dropped).
    taps = _pool_tap_patches(x, 5, 5)                      # 4 x (B*25, 288) bf16
    x = conv3x3_relu_pool(taps, kp["c2_w"], kp["c2_b"])    # (B*25, 64) bf16

    # Row-major (b*25 + p, c) -> (b, p*64 + c): pure reshape, no transpose;
    # fc1's weight columns were pre-permuted to this (h, w, c) order.
    x = x.reshape(B, 64 * 5 * 5)

    # fc1 + ReLU + fc2, fused in one Pallas kernel.
    return fc_fused(x, kp["fc1_w"], kp["fc1_b"], kp["fc2_w"], kp["fc2_b"])


if __name__ == "__main__":
    key = jax.random.PRNGKey(0)
    k_param, k_input = jax.random.split(key)
    params = pack_params(init_params(k_param))
    # Batch=2, single channel, 28x28 (required by fc1's 64*5*5 input size).
    x = jax.random.normal(k_input, (2, 1, 28, 28), jnp.float32)
    out = net_forward(params, x)
    jax.block_until_ready(out)
    assert out.shape == (2, 10)
    print("KERNEL_OK")
</pallas_src>

<mosaic_0001>
module attributes {stable_mosaic.version = 11 : i64} {
  func.func @_conv_pool_kernel(%arg0: memref<338x9xbf16, #tpu.memory_space<vmem>>, %arg1: memref<338x9xbf16, #tpu.memory_space<vmem>>, %arg2: memref<338x9xbf16, #tpu.memory_space<vmem>>, %arg3: memref<338x9xbf16, #tpu.memory_space<vmem>>, %arg4: memref<9x32xbf16, #tpu.memory_space<vmem>>, %arg5: memref<1x32xf32, #tpu.memory_space<vmem>>, %arg6: memref<338x32xbf16, #tpu.memory_space<vmem>>) attributes {dimension_semantics = [], scalar_prefetch = 0 : i64, scratch_operands = 0 : i64, tpu.core_type = #tpu.core_type<tc>} {
    %c0 = arith.constant 0 : index
    %c0_0 = arith.constant 0 : index
    %0 = vector.load %arg4[%c0, %c0_0] : memref<9x32xbf16, #tpu.memory_space<vmem>>, vector<9x32xbf16>
    %c0_1 = arith.constant 0 : index
    %c0_2 = arith.constant 0 : index
    %1 = vector.load %arg0[%c0_1, %c0_2] : memref<338x9xbf16, #tpu.memory_space<vmem>>, vector<338x9xbf16>
    %cst = arith.constant dense<0.000000e+00> : vector<338x32xf32>
    %2 = tpu.matmul %1, %0, %cst {dimension_numbers = #tpu.dot_dimension_numbers<[1], [0], [0], [1], [0, 0, 1, 1], [], []>} : vector<338x9xbf16>, vector<9x32xbf16>, vector<338x32xf32> -> vector<338x32xf32>
    %c0_3 = arith.constant 0 : index
    %c0_4 = arith.constant 0 : index
    %3 = vector.load %arg1[%c0_3, %c0_4] : memref<338x9xbf16, #tpu.memory_space<vmem>>, vector<338x9xbf16>
    %cst_5 = arith.constant dense<0.000000e+00> : vector<338x32xf32>
    %4 = tpu.matmul %3, %0, %cst_5 {dimension_numbers = #tpu.dot_dimension_numbers<[1], [0], [0], [1], [0, 0, 1, 1], [], []>} : vector<338x9xbf16>, vector<9x32xbf16>, vector<338x32xf32> -> vector<338x32xf32>
    %5 = arith.maximumf %2, %4 : vector<338x32xf32>
    %c0_6 = arith.constant 0 : index
    %c0_7 = arith.constant 0 : index
    %6 = vector.load %arg2[%c0_6, %c0_7] : memref<338x9xbf16, #tpu.memory_space<vmem>>, vector<338x9xbf16>
    %cst_8 = arith.constant dense<0.000000e+00> : vector<338x32xf32>
    %7 = tpu.matmul %6, %0, %cst_8 {dimension_numbers = #tpu.dot_dimension_numbers<[1], [0], [0], [1], [0, 0, 1, 1], [], []>} : vector<338x9xbf16>, vector<9x32xbf16>, vector<338x32xf32> -> vector<338x32xf32>
    %8 = arith.maximumf %5, %7 : vector<338x32xf32>
    %c0_9 = arith.constant 0 : index
    %c0_10 = arith.constant 0 : index
    %9 = vector.load %arg3[%c0_9, %c0_10] : memref<338x9xbf16, #tpu.memory_space<vmem>>, vector<338x9xbf16>
    %cst_11 = arith.constant dense<0.000000e+00> : vector<338x32xf32>
    %10 = tpu.matmul %9, %0, %cst_11 {dimension_numbers = #tpu.dot_dimension_numbers<[1], [0], [0], [1], [0, 0, 1, 1], [], []>} : vector<338x9xbf16>, vector<9x32xbf16>, vector<338x32xf32> -> vector<338x32xf32>
    %11 = arith.maximumf %8, %10 : vector<338x32xf32>
    %c0_12 = arith.constant 0 : index
    %c0_13 = arith.constant 0 : index
    %12 = vector.load %arg5[%c0_12, %c0_13] : memref<1x32xf32, #tpu.memory_space<vmem>>, vector<1x32xf32>
    %13 = vector.broadcast %12 : vector<1x32xf32> to vector<338x32xf32>
    %14 = arith.addf %11, %13 : vector<338x32xf32>
    %cst_14 = arith.constant 0.000000e+00 : f32
    %15 = vector.broadcast %cst_14 : f32 to vector<338x32xf32>
    %16 = arith.maximumf %14, %15 : vector<338x32xf32>
    %17 = arith.truncf %16 : vector<338x32xf32> to vector<338x32xbf16>
    %c0_15 = arith.constant 0 : index
    %c0_16 = arith.constant 0 : index
    %18 = vector.load %arg6[%c0_15, %c0_16] : memref<338x32xbf16, #tpu.memory_space<vmem>>, vector<338x32xbf16>
    tpu.vector_store %arg6[%c0_15, %c0_16], %17 {strides = array<i32>} : memref<338x32xbf16, #tpu.memory_space<vmem>>, vector<338x32xbf16>,
    return
  }
}

module attributes {stable_mosaic.version = 11 : i64} {
  func.func @_conv_pool_kernel(%arg0: memref<50x288xbf16, #tpu.memory_space<vmem>>, %arg1: memref<50x288xbf16, #tpu.memory_space<vmem>>, %arg2: memref<50x288xbf16, #tpu.memory_space<vmem>>, %arg3: memref<50x288xbf16, #tpu.memory_space<vmem>>, %arg4: memref<288x64xbf16, #tpu.memory_space<vmem>>, %arg5: memref<1x64xf32, #tpu.memory_space<vmem>>, %arg6: memref<50x64xbf16, #tpu.memory_space<vmem>>) attributes {dimension_semantics = [], scalar_prefetch = 0 : i64, scratch_operands = 0 : i64, tpu.core_type = #tpu.core_type<tc>} {
    %c0 = arith.constant 0 : index
    %c0_0 = arith.constant 0 : index
    %0 = vector.load %arg4[%c0, %c0_0] : memref<288x64xbf16, #tpu.memory_space<vmem>>, vector<288x64xbf16>
    %c0_1 = arith.constant 0 : index
    %c0_2 = arith.constant 0 : index
    %1 = vector.load %arg0[%c0_1, %c0_2] : memref<50x288xbf16, #tpu.memory_space<vmem>>, vector<50x288xbf16>
    %cst = arith.constant dense<0.000000e+00> : vector<50x64xf32>
    %2 = tpu.matmul %1, %0, %cst {dimension_numbers = #tpu.dot_dimension_numbers<[1], [0], [0], [1], [0, 0, 1, 1], [], []>} : vector<50x288xbf16>, vector<288x64xbf16>, vector<50x64xf32> -> vector<50x64xf32>
    %c0_3 = arith.constant 0 : index
    %c0_4 = arith.constant 0 : index
    %3 = vector.load %arg1[%c0_3, %c0_4] : memref<50x288xbf16, #tpu.memory_space<vmem>>, vector<50x288xbf16>
    %cst_5 = arith.constant dense<0.000000e+00> : vector<50x64xf32>
    %4 = tpu.matmul %3, %0, %cst_5 {dimension_numbers = #tpu.dot_dimension_numbers<[1], [0], [0], [1], [0, 0, 1, 1], [], []>} : vector<50x288xbf16>, vector<288x64xbf16>, vector<50x64xf32> -> vector<50x64xf32>
    %5 = arith.maximumf %2, %4 : vector<50x64xf32>
    %c0_6 = arith.constant 0 : index
    %c0_7 = arith.constant 0 : index
    %6 = vector.load %arg2[%c0_6, %c0_7] : memref<50x288xbf16, #tpu.memory_space<vmem>>, vector<50x288xbf16>
    %cst_8 = arith.constant dense<0.000000e+00> : vector<50x64xf32>
    %7 = tpu.matmul %6, %0, %cst_8 {dimension_numbers = #tpu.dot_dimension_numbers<[1], [0], [0], [1], [0, 0, 1, 1], [], []>} : vector<50x288xbf16>, vector<288x64xbf16>, vector<50x64xf32> -> vector<50x64xf32>
    %8 = arith.maximumf %5, %7 : vector<50x64xf32>
    %c0_9 = arith.constant 0 : index
    %c0_10 = arith.constant 0 : index
    %9 = vector.load %arg3[%c0_9, %c0_10] : memref<50x288xbf16, #tpu.memory_space<vmem>>, vector<50x288xbf16>
    %cst_11 = arith.constant dense<0.000000e+00> : vector<50x64xf32>
    %10 = tpu.matmul %9, %0, %cst_11 {dimension_numbers = #tpu.dot_dimension_numbers<[1], [0], [0], [1], [0, 0, 1, 1], [], []>} : vector<50x288xbf16>, vector<288x64xbf16>, vector<50x64xf32> -> vector<50x64xf32>
    %11 = arith.maximumf %8, %10 : vector<50x64xf32>
    %c0_12 = arith.constant 0 : index
    %c0_13 = arith.constant 0 : index
    %12 = vector.load %arg5[%c0_12, %c0_13] : memref<1x64xf32, #tpu.memory_space<vmem>>, vector<1x64xf32>
    %13 = vector.broadcast %12 : vector<1x64xf32> to vector<50x64xf32>
    %14 = arith.addf %11, %13 : vector<50x64xf32>
    %cst_14 = arith.constant 0.000000e+00 : f32
    %15 = vector.broadcast %cst_14 : f32 to vector<50x64xf32>
    %16 = arith.maximumf %14, %15 : vector<50x64xf32>
    %17 = arith.truncf %16 : vector<50x64xf32> to vector<50x64xbf16>
    %c0_15 = arith.constant 0 : index
    %c0_16 = arith.constant 0 : index
    %18 = vector.load %arg6[%c0_15, %c0_16] : memref<50x64xbf16, #tpu.memory_space<vmem>>, vector<50x64xbf16>
    tpu.vector_store %arg6[%c0_15, %c0_16], %17 {strides = array<i32>} : memref<50x64xbf16, #tpu.memory_space<vmem>>, vector<50x64xbf16>,
    return
  }
}

module attributes {stable_mosaic.version = 11 : i64} {
  func.func @_fc_fused_kernel(%arg0: memref<2x1600xbf16, #tpu.memory_space<vmem>>, %arg1: memref<1600x128xbf16, #tpu.memory_space<vmem>>, %arg2: memref<1x128xf32, #tpu.memory_space<vmem>>, %arg3: memref<128x10xbf16, #tpu.memory_space<vmem>>, %arg4: memref<1x10xf32, #tpu.memory_space<vmem>>, %arg5: memref<2x10xf32, #tpu.memory_space<vmem>>) attributes {dimension_semantics = [], scalar_prefetch = 0 : i64, scratch_operands = 0 : i64, tpu.core_type = #tpu.core_type<tc>} {
    %c0 = arith.constant 0 : index
    %c0_0 = arith.constant 0 : index
    %0 = vector.load %arg0[%c0, %c0_0] : memref<2x1600xbf16, #tpu.memory_space<vmem>>, vector<2x1600xbf16>
    %c0_1 = arith.constant 0 : index
    %c0_2 = arith.constant 0 : index
    %1 = vector.load %arg1[%c0_1, %c0_2] : memref<1600x128xbf16, #tpu.memory_space<vmem>>, vector<1600x128xbf16>
    %cst = arith.constant dense<0.000000e+00> : vector<2x128xf32>
    %2 = tpu.matmul %0, %1, %cst {dimension_numbers = #tpu.dot_dimension_numbers<[1], [0], [0], [1], [0, 0, 1, 1], [], []>} : vector<2x1600xbf16>, vector<1600x128xbf16>, vector<2x128xf32> -> vector<2x128xf32>
    %c0_3 = arith.constant 0 : index
    %c0_4 = arith.constant 0 : index
    %3 = vector.load %arg2[%c0_3, %c0_4] : memref<1x128xf32, #tpu.memory_space<vmem>>, vector<1x128xf32>
    %4 = vector.broadcast %3 : vector<1x128xf32> to vector<2x128xf32>
    %5 = arith.addf %2, %4 : vector<2x128xf32>
    %cst_5 = arith.constant 0.000000e+00 : f32
    %6 = vector.broadcast %cst_5 : f32 to vector<2x128xf32>
    %7 = arith.maximumf %5, %6 : vector<2x128xf32>
    %8 = arith.truncf %7 : vector<2x128xf32> to vector<2x128xbf16>
    %c0_6 = arith.constant 0 : index
    %c0_7 = arith.constant 0 : index
    %9 = vector.load %arg3[%c0_6, %c0_7] : memref<128x10xbf16, #tpu.memory_space<vmem>>, vector<128x10xbf16>
    %cst_8 = arith.constant dense<0.000000e+00> : vector<2x10xf32>
    %10 = tpu.matmul %8, %9, %cst_8 {dimension_numbers = #tpu.dot_dimension_numbers<[1], [0], [0], [1], [0, 0, 1, 1], [], []>} : vector<2x128xbf16>, vector<128x10xbf16>, vector<2x10xf32> -> vector<2x10xf32>
    %c0_9 = arith.constant 0 : index
    %c0_10 = arith.constant 0 : index
    %11 = vector.load %arg4[%c0_9, %c0_10] : memref<1x10xf32, #tpu.memory_space<vmem>>, vector<1x10xf32>
    %12 = vector.broadcast %11 : vector<1x10xf32> to vector<2x10xf32>
    %13 = arith.addf %10, %12 : vector<2x10xf32>
    %c0_11 = arith.constant 0 : index
    %c0_12 = arith.constant 0 : index
    %14 = vector.load %arg5[%c0_11, %c0_12] : memref<2x10xf32, #tpu.memory_space<vmem>>, vector<2x10xf32>
    tpu.vector_store %arg5[%c0_11, %c0_12], %13 {strides = array<i32>} : memref<2x10xf32, #tpu.memory_space<vmem>>, vector<2x10xf32>,
    return
  }
}

</mosaic_0001>

<bundles_post_ra>
// kernel: net_forward.3
= control target key start
LH: loop header
LB: loop body
LE: loop exit
PB: predicated region body
PF: predicated region fallthrough
CT: control target
= control target key end

     0   :  { %vm249_vm0 = vcmask 1043456   ;;  %vm250_vm1 = vcmask 1044480   ;;  %vm182_vm2 = vcmask 72704   ;;  %v2813_v1 = vmov 65535   ;;  %s3810_s4 = inlined_call_operand.vmem [shape: bf16[9,32], index: 4, kind: input, shape index: {}]   ;;  %s3811_s0 = inlined_call_operand.vmem [shape: bf16[338,9], index: 0, kind: input, shape index: {}]   ;;  %s3812_s1 = inlined_call_operand.vmem [shape: bf16[338,9], index: 1, kind: input, shape index: {}]   ;;  %s3813_s2 = inlined_call_operand.vmem [shape: bf16[338,9], index: 2, kind: input, shape index: {}]   ;;  %s3814_s3 = inlined_call_operand.vmem [shape: bf16[338,9], index: 3, kind: input, shape index: {}]   ;;  %s3815_s5 = inlined_call_operand.vmem [shape: f32[1,32], index: 5, kind: input, shape index: {}]   ;;  %s3816_s6 = inlined_call_operand.vmem [shape: bf16[338,32], index: 6, kind: output, shape index: {}]  }
   0x1   :  { %v2724_v0 = vld [vmem:[%s3810_s4] sm:$0x1f]   ;;  %v251_v2 = vsel %vm249_vm0, 4294967295, %v2813_v1  ;;  %v2727_v7 = vld [vmem:[%s3811_s0 + $0x8] sm:$0xff]   ;;  %v2729_v9 = vld [vmem:[%s3811_s0 + $0x10] sm:$0xff]   ;;  %vm2134_vm3 = vcmask 257024  }
   0x2   :  { %v2725_v3 = vld [vmem:[%s3811_s0] sm:$0xff]   ;;  %v252_v4 = vsel %vm250_vm1, %v251_v2, 0  ;;  %v2728_v8 = vld [vmem:[%s3812_s1 + $0x8] sm:$0xff]   ;;  %v2730_v10 = vld [vmem:[%s3812_s1 + $0x10] sm:$0xff]   ;;  %vm2177_vm4 = vcmask 253952  }
   0x3   :  { %v2726_v5 = vld [vmem:[%s3812_s1] sm:$0xff]   ;;  %v254_v6 = vand.u32 %v2724_v0, %v252_v4  ;;  %2541 = vmatprep.mubr.msk.bf16.mxu0 %vm182_vm2, %v2725_v3  ;;  %v2731_v11 = vld [vmem:[%s3811_s0 + $0x18] sm:$0xff]   ;;  %v2735_v15 = vld [vmem:[%s3811_s0 + $0x28] sm:$0xff]  }
   0x4   :  { %2587 = vmatprep.mubr.msk.bf16.mxu1 %vm182_vm2, %v2726_v5  ;;  %v2732_v12 = vld [vmem:[%s3812_s1 + $0x18] sm:$0xff]   ;;  %v2733_v13 = vld [vmem:[%s3811_s0 + $0x20] sm:$0xff]   ;;  %v2736_v16 = vld [vmem:[%s3812_s1 + $0x28] sm:$0xff]  }
   0x5   :  { %2539 = vmatprep.subr.bf16.mxu0 %v254_v6  ;;  %2585 = vmatprep.subr.bf16.mxu1 %v254_v6  ;;  %v2734_v14 = vld [vmem:[%s3812_s1 + $0x20] sm:$0xff]   ;;  %v2737_v17 = vld [vmem:[%s3811_s0 + $0x30] sm:$0xff]   ;;  %v2739_v19 = vld [vmem:[%s3811_s0 + $0x38] sm:$0xff]  }
   0x6   :  { %2540 = vmatpush3.bf16.msra.mxu0 %v254_v6  ;;  %2586 = vmatpush3.bf16.msra.mxu1 %v254_v6  ;;  %v2738_v18 = vld [vmem:[%s3812_s1 + $0x30] sm:$0xff]   ;;  %v2740_v20 = vld [vmem:[%s3812_s1 + $0x38] sm:$0xff]   ;;  %v2741_v21 = vld [vmem:[%s3811_s0 + $0x40] sm:$0xff]  }
   0x7   :  { %2631 = vmatprep.subr.bf16.mxu0 %v254_v6  ;;  %2677 = vmatprep.subr.bf16.mxu1 %v254_v6  ;;  %v2742_v22 = vld [vmem:[%s3812_s1 + $0x40] sm:$0xff]   ;;  %v2743_v23 = vld [vmem:[%s3811_s0 + $0x48] sm:$0xff]   ;;  %v2745_v25 = vld [vmem:[%s3811_s0 + $0x50] sm:$0xff]  }
   0x8   :  { %v2744_v24 = vld [vmem:[%s3812_s1 + $0x48] sm:$0xff]   ;;  %v2746_v26 = vld [vmem:[%s3812_s1 + $0x50] sm:$0xff]   ;;  %v2747_v27 = vld [vmem:[%s3811_s0 + $0x58] sm:$0xff]  }
   0x9   :  { %2542 = vmatmul.mubr.msk.bf16.vlgmr.msra.gmra.mrb[0].mxu0 %vm182_vm2, %v2727_v7  ;;  %2588 = vmatmul.mubr.msk.bf16.vlgmr.msra.gmra.mrb[0].mxu1 %vm182_vm2, %v2728_v8  ;;  %v2748_v28 = vld [vmem:[%s3812_s1 + $0x58] sm:$0xff]   ;;  %v2749_v29 = vld [vmem:[%s3811_s0 + $0x60] sm:$0xff]   ;;  %v2751_v31 = vld [vmem:[%s3811_s0 + $0x68] sm:$0xff]  }
   0xa   :  { %2632 = vmatpush3.bf16.msra.mxu0 %v254_v6  ;;  %2678 = vmatpush3.bf16.msra.mxu1 %v254_v6  ;;  %v2750_v30 = vld [vmem:[%s3812_s1 + $0x60] sm:$0xff]   ;;  %v2752_v32 = vld [vmem:[%s3812_s1 + $0x68] sm:$0xff]   ;;  %v2753_v33 = vld [vmem:[%s3811_s0 + $0x70] sm:$0xff]  }
   0xb   :  { %2545 = vmatprep.mubr.msk.bf16.mxu0 %vm182_vm2, %v2729_v9  ;;  %2591 = vmatprep.mubr.msk.bf16.mxu1 %vm182_vm2, %v2730_v10  ;;  %v2754_v34 = vld [vmem:[%s3812_s1 + $0x70] sm:$0xff]   ;;  %v2755_v35 = vld [vmem:[%s3811_s0 + $0x78] sm:$0xff]   ;;  %v2757_v37 = vld [vmem:[%s3811_s0 + $0x80] sm:$0xff]  }
   0xc   :  { %v2756_v36 = vld [vmem:[%s3812_s1 + $0x78] sm:$0xff]   ;;  %v2758_v38 = vld [vmem:[%s3812_s1 + $0x80] sm:$0xff]   ;;  %v2759_v39 = vld [vmem:[%s3811_s0 + $0x88] sm:$0xff]  }
   0xd   :  { %v2760_v40 = vld [vmem:[%s3812_s1 + $0x88] sm:$0xff]   ;;  %v2761_v41 = vld [vmem:[%s3811_s0 + $0x90] sm:$0xff]   ;;  %v2763_v43 = vld [vmem:[%s3811_s0 + $0x98] sm:$0xff]  }
   0xe   :  { %v2762_v42 = vld [vmem:[%s3812_s1 + $0x90] sm:$0xff]   ;;  %v2764_v44 = vld [vmem:[%s3812_s1 + $0x98] sm:$0xff]   ;;  %v2765_v45 = vld [vmem:[%s3811_s0 + $0xa0] sm:$0xff]  }
   0xf   :  { %v2766_v46 = vld [vmem:[%s3812_s1 + $0xa0] sm:$0xff]   ;;  %v2767_v47 = vld [vmem:[%s3811_s0 + $0xa8] ss:$0 sps:$4 sm:$0x11]   ;;  %v2773_v53 = vld [vmem:[%s3813_s2 + $0x10] sm:$0xff]  }
  0x10   :  { %v2768_v48 = vld [vmem:[%s3812_s1 + $0xa8] ss:$0 sps:$4 sm:$0x11]   ;;  %v2769_v49 = vld [vmem:[%s3813_s2] sm:$0xff]   ;;  %v2774_v54 = vld [vmem:[%s3814_s3 + $0x10] sm:$0xff]  }
  0x11   :  { %2546 = vmatmul.mubr.msk.bf16.gmra.mrb[4].mxu0 %vm182_vm2, %v2731_v11  ;;  %2592 = vmatmul.mubr.msk.bf16.gmra.mrb[4].mxu1 %vm182_vm2, %v2732_v12  ;;  %v2770_v50 = vld [vmem:[%s3814_s3] sm:$0xff]   ;;  %v2771_v51 = vld [vmem:[%s3813_s2 + $0x8] sm:$0xff]   ;;  %v2775_v55 = vld [vmem:[%s3813_s2 + $0x18] sm:$0xff]  }
  0x12   :  { %2549 = vmatprep.mubr.msk.bf16.mxu0 %vm182_vm2, %v2733_v13  ;;  %2595 = vmatprep.mubr.msk.bf16.mxu1 %vm182_vm2, %v2734_v14  ;;  %v2772_v52 = vld [vmem:[%s3814_s3 + $0x8] sm:$0xff]   ;;  %v2776_v56 = vld [vmem:[%s3814_s3 + $0x18] sm:$0xff]   ;;  %v2777_v57 = vld [vmem:[%s3813_s2 + $0x20] sm:$0xff]  }
  0x13   :  { %v2778_v58 = vld [vmem:[%s3814_s3 + $0x20] sm:$0xff]   ;;  %v2779_v59 = vld [vmem:[%s3813_s2 + $0x28] sm:$0xff]   ;;  %v2781_v61 = vld [vmem:[%s3813_s2 + $0x30] sm:$0xff]  }
  0x14   :  { %v2780_v60 = vld [vmem:[%s3814_s3 + $0x28] sm:$0xff]   ;;  %v2782_v62 = vld [vmem:[%s3814_s3 + $0x30] sm:$0xff]   ;;  %v2783_v63 = vld [vmem:[%s3813_s2 + $0x38] sm:$0xff]  }
  0x15   :  { %v2784_v0 = vld [vmem:[%s3814_s3 + $0x38] sm:$0xff]   ;;  %v2785_v1 = vld [vmem:[%s3813_s2 + $0x40] sm:$0xff]   ;;  %v2787_v3 = vld [vmem:[%s3813_s2 + $0x48] sm:$0xff]  }
  0x16   :  { %v2786_v2 = vld [vmem:[%s3814_s3 + $0x40] sm:$0xff]   ;;  %v2788_v4 = vld [vmem:[%s3814_s3 + $0x48] sm:$0xff]   ;;  %v2789_v5 = vld [vmem:[%s3813_s2 + $0x50] sm:$0xff]  }
  0x17   :  { %v2790_v6 = vld [vmem:[%s3814_s3 + $0x50] sm:$0xff]   ;;  %v2791_v7 = vld [vmem:[%s3813_s2 + $0x58] sm:$0xff]   ;;  %v2793_v9 = vld [vmem:[%s3813_s2 + $0x60] sm:$0xff]  }
  0x18   :  { %v2792_v8 = vld [vmem:[%s3814_s3 + $0x58] sm:$0xff]   ;;  %v2794_v10 = vld [vmem:[%s3814_s3 + $0x60] sm:$0xff]   ;;  %v2795_v11 = vld [vmem:[%s3813_s2 + $0x68] sm:$0xff]  }
  0x19   :  { %2550 = vmatmul.mubr.msk.bf16.gmra.mrb[8].mxu0 %vm182_vm2, %v2735_v15  ;;  %2596 = vmatmul.mubr.msk.bf16.gmra.mrb[8].mxu1 %vm182_vm2, %v2736_v16  ;;  %v2796_v12 = vld [vmem:[%s3814_s3 + $0x68] sm:$0xff]   ;;  %v2797_v13 = vld [vmem:[%s3813_s2 + $0x70] sm:$0xff]   ;;  %v2799_v15 = vld [vmem:[%s3813_s2 + $0x78] sm:$0xff]  }
  0x1a   :  { %2553 = vmatprep.mubr.msk.bf16.mxu0 %vm182_vm2, %v2737_v17  ;;  %2599 = vmatprep.mubr.msk.bf16.mxu1 %vm182_vm2, %v2738_v18  ;;  %v2798_v14 = vld [vmem:[%s3814_s3 + $0x70] sm:$0xff]   ;;  %v2800_v16 = vld [vmem:[%s3814_s3 + $0x78] sm:$0xff]   ;;  %v2801_v17 = vld [vmem:[%s3813_s2 + $0x80] sm:$0xff]  }
  0x1b   :  { %v2802_v18 = vld [vmem:[%s3814_s3 + $0x80] sm:$0xff]  }
  0x21   :  { %2554 = vmatmul.mubr.msk.bf16.gmra.mrb[12].mxu0 %vm182_vm2, %v2739_v19  ;;  %2600 = vmatmul.mubr.msk.bf16.gmra.mrb[12].mxu1 %vm182_vm2, %v2740_v20  ;;  %v2803_v19 = vld [vmem:[%s3813_s2 + $0x88] sm:$0xff]  }
  0x22   :  { %2557 = vmatprep.mubr.msk.bf16.mxu0 %vm182_vm2, %v2741_v21  ;;  %2603 = vmatprep.mubr.msk.bf16.mxu1 %vm182_vm2, %v2742_v22  ;;  %v2804_v20 = vld [vmem:[%s3814_s3 + $0x88] sm:$0xff]   ;;  %v2805_v21 = vld [vmem:[%s3813_s2 + $0x90] sm:$0xff]  }
  0x23   :  { %v2806_v22 = vld [vmem:[%s3814_s3 + $0x90] sm:$0xff]  }
  0x29   :  { %2558 = vmatmul.mubr.msk.bf16.gmra.mrb[16].mxu0 %vm182_vm2, %v2743_v23  ;;  %2604 = vmatmul.mubr.msk.bf16.gmra.mrb[16].mxu1 %vm182_vm2, %v2744_v24  ;;  %v2807_v23 = vld [vmem:[%s3813_s2 + $0x98] sm:$0xff]  }
  0x2a   :  { %2561 = vmatprep.mubr.msk.bf16.mxu0 %vm182_vm2, %v2745_v25  ;;  %2607 = vmatprep.mubr.msk.bf16.mxu1 %vm182_vm2, %v2746_v26  ;;  %v2808_v24 = vld [vmem:[%s3814_s3 + $0x98] sm:$0xff]   ;;  %v2809_v25 = vld [vmem:[%s3813_s2 + $0xa0] sm:$0xff]  }
  0x2b   :  { %v2810_v26 = vld [vmem:[%s3814_s3 + $0xa0] sm:$0xff]  }
  0x31   :  { %2562 = vmatmul.mubr.msk.bf16.gmra.mrb[20].mxu0 %vm182_vm2, %v2747_v27  ;;  %2608 = vmatmul.mubr.msk.bf16.gmra.mrb[20].mxu1 %vm182_vm2, %v2748_v28  ;;  %v2811_v27 = vld [vmem:[%s3813_s2 + $0xa8] ss:$0 sps:$4 sm:$0x11]  }
  0x32   :  { %2565 = vmatprep.mubr.msk.bf16.mxu0 %vm182_vm2, %v2749_v29  ;;  %2611 = vmatprep.mubr.msk.bf16.mxu1 %vm182_vm2, %v2750_v30  ;;  %v2812_v28 = vld [vmem:[%s3814_s3 + $0xa8] ss:$0 sps:$4 sm:$0x11]  }
  0x39   :  { %2566 = vmatmul.mubr.msk.bf16.gmra.mrb[24].mxu0 %vm182_vm2, %v2751_v31  ;;  %2612 = vmatmul.mubr.msk.bf16.gmra.mrb[24].mxu1 %vm182_vm2, %v2752_v32 }
  0x3a   :  { %2569 = vmatprep.mubr.msk.bf16.mxu0 %vm182_vm2, %v2753_v33  ;;  %2615 = vmatprep.mubr.msk.bf16.mxu1 %vm182_vm2, %v2754_v34 }
  0x41   :  { %2570 = vmatmul.mubr.msk.bf16.gmra.mrb[28].mxu0 %vm182_vm2, %v2755_v35  ;;  %2616 = vmatmul.mubr.msk.bf16.gmra.mrb[28].mxu1 %vm182_vm2, %v2756_v36 }
  0x42   :  { %2573 = vmatprep.mubr.msk.bf16.mxu0 %vm182_vm2, %v2757_v37  ;;  %2619 = vmatprep.mubr.msk.bf16.mxu1 %vm182_vm2, %v2758_v38 }
  0x49   :  { %2574 = vmatmul.mubr.msk.bf16.gmra.mrb[32].mxu0 %vm182_vm2, %v2759_v39  ;;  %2620 = vmatmul.mubr.msk.bf16.gmra.mrb[32].mxu1 %vm182_vm2, %v2760_v40 }
  0x4a   :  { %2577 = vmatprep.mubr.msk.bf16.mxu0 %vm182_vm2, %v2761_v41  ;;  %2623 = vmatprep.mubr.msk.bf16.mxu1 %vm182_vm2, %v2762_v42 }
  0x51   :  { %2578 = vmatmul.mubr.msk.bf16.gmra.mrb[36].mxu0 %vm182_vm2, %v2763_v43  ;;  %2624 = vmatmul.mubr.msk.bf16.gmra.mrb[36].mxu1 %vm182_vm2, %v2764_v44 }
  0x52   :  { %2581 = vmatprep.mubr.msk.bf16.mxu0 %vm182_vm2, %v2765_v45  ;;  %2627 = vmatprep.mubr.msk.bf16.mxu1 %vm182_vm2, %v2766_v46 }
  0x59   :  { %2582 = vmatmul.mubr.msk.bf16.gmra.mrb[40].mxu0 %vm182_vm2, %v2767_v47  ;;  %2628 = vmatmul.mubr.msk.bf16.gmra.mrb[40].mxu1 %vm182_vm2, %v2768_v48 }
  0x5a   :  { %2633 = vmatprep.mubr.msk.bf16.mxu0 %vm182_vm2, %v2769_v49  ;;  %2679 = vmatprep.mubr.msk.bf16.mxu1 %vm182_vm2, %v2770_v50 }
  0x61   :  { %2634 = vmatmul.mubr.msk.bf16.vlgmr.msra.gmra.mrb[44].mxu0 %vm182_vm2, %v2771_v51  ;;  %2680 = vmatmul.mubr.msk.bf16.vlgmr.msra.gmra.mrb[44].mxu1 %vm182_vm2, %v2772_v52 }
  0x62   :  { %2637 = vmatprep.mubr.msk.bf16.mxu0 %vm182_vm2, %v2773_v53  ;;  %2683 = vmatprep.mubr.msk.bf16.mxu1 %vm182_vm2, %v2774_v54 }
  0x69   :  { %2638 = vmatmul.mubr.msk.bf16.gmra.mrb[48].mxu0 %vm182_vm2, %v2775_v55  ;;  %2684 = vmatmul.mubr.msk.bf16.gmra.mrb[48].mxu1 %vm182_vm2, %v2776_v56 }
  0x6a   :  { %2641 = vmatprep.mubr.msk.bf16.mxu0 %vm182_vm2, %v2777_v57  ;;  %2687 = vmatprep.mubr.msk.bf16.mxu1 %vm182_vm2, %v2778_v58 }
  0x71   :  { %2642 = vmatmul.mubr.msk.bf16.gmra.mrb[52].mxu0 %vm182_vm2, %v2779_v59  ;;  %2688 = vmatmul.mubr.msk.bf16.gmra.mrb[52].mxu1 %vm182_vm2, %v2780_v60 }
  0x72   :  { %2645 = vmatprep.mubr.msk.bf16.mxu0 %vm182_vm2, %v2781_v61  ;;  %2691 = vmatprep.mubr.msk.bf16.mxu1 %vm182_vm2, %v2782_v62 }
  0x79   :  { %2646 = vmatmul.mubr.msk.bf16.gmra.mrb[56].mxu0 %vm182_vm2, %v2783_v63  ;;  %2692 = vmatmul.mubr.msk.bf16.gmra.mrb[56].mxu1 %vm182_vm2, %v2784_v0 }
  0x7a   :  { %2649 = vmatprep.mubr.msk.bf16.mxu0 %vm182_vm2, %v2785_v1  ;;  %2695 = vmatprep.mubr.msk.bf16.mxu1 %vm182_vm2, %v2786_v2 }
  0x81   :  { %2650 = vmatmul.mubr.msk.bf16.gmra.mrb[60].mxu0 %vm182_vm2, %v2787_v3  ;;  %2696 = vmatmul.mubr.msk.bf16.gmra.mrb[60].mxu1 %vm182_vm2, %v2788_v4 }
  0x82   :  { %2653 = vmatprep.mubr.msk.bf16.mxu0 %vm182_vm2, %v2789_v5  ;;  %2699 = vmatprep.mubr.msk.bf16.mxu1 %vm182_vm2, %v2790_v6 }
  0x89   :  { %2654 = vmatmul.mubr.msk.bf16.gmra.mrb[64].mxu0 %vm182_vm2, %v2791_v7  ;;  %2700 = vmatmul.mubr.msk.bf16.gmra.mrb[64].mxu1 %vm182_vm2, %v2792_v8 }
  0x8a   :  { %2657 = vmatprep.mubr.msk.bf16.mxu0 %vm182_vm2, %v2793_v9  ;;  %2703 = vmatprep.mubr.msk.bf16.mxu1 %vm182_vm2, %v2794_v10 }
  0x91   :  { %2658 = vmatmul.mubr.msk.bf16.gmra.mrb[68].mxu0 %vm182_vm2, %v2795_v11  ;;  %2704 = vmatmul.mubr.msk.bf16.gmra.mrb[68].mxu1 %vm182_vm2, %v2796_v12 }
  0x92   :  { %2661 = vmatprep.mubr.msk.bf16.mxu0 %vm182_vm2, %v2797_v13  ;;  %2707 = vmatprep.mubr.msk.bf16.mxu1 %vm182_vm2, %v2798_v14 }
  0x99   :  { %2662 = vmatmul.mubr.msk.bf16.gmra.mrb[72].mxu0 %vm182_vm2, %v2799_v15  ;;  %2708 = vmatmul.mubr.msk.bf16.gmra.mrb[72].mxu1 %vm182_vm2, %v2800_v16 }
  0x9a   :  { %2665 = vmatprep.mubr.msk.bf16.mxu0 %vm182_vm2, %v2801_v17  ;;  %2711 = vmatprep.mubr.msk.bf16.mxu1 %vm182_vm2, %v2802_v18 }
  0xa1   :  { %2666 = vmatmul.mubr.msk.bf16.gmra.mrb[76].mxu0 %vm182_vm2, %v2803_v19  ;;  %2712 = vmatmul.mubr.msk.bf16.gmra.mrb[76].mxu1 %vm182_vm2, %v2804_v20 }
  0xa2   :  { %2669 = vmatprep.mubr.msk.bf16.mxu0 %vm182_vm2, %v2805_v21  ;;  %2715 = vmatprep.mubr.msk.bf16.mxu1 %vm182_vm2, %v2806_v22 }
  0xa9   :  { %2670 = vmatmul.mubr.msk.bf16.gmra.mrb[80].mxu0 %vm182_vm2, %v2807_v23  ;;  %2716 = vmatmul.mubr.msk.bf16.gmra.mrb[80].mxu1 %vm182_vm2, %v2808_v24 }
  0xaa   :  { %2673 = vmatprep.mubr.msk.bf16.mxu0 %vm182_vm2, %v2809_v25  ;;  %2719 = vmatprep.mubr.msk.bf16.mxu1 %vm182_vm2, %v2810_v26 }
  0xb1   :  { %2674 = vmatmul.mubr.msk.bf16.gmra.mrb[84].mxu0 %vm182_vm2, %v2811_v27  ;;  %2720 = vmatmul.mubr.msk.bf16.gmra.mrb[84].mxu1 %vm182_vm2, %v2812_v28 }
  0xdc   :  { %v3204_v29 = vpop.f32.mrb[0].mxu0  ;;  %v3206_v30 = vpop.f32.mrb[0].mxu1 }
  0xdd   :  { %v3210_v32 = vpop.f32.mrb[1].mxu0  ;;  %v3212_v33 = vpop.f32.mrb[1].mxu1  ;;  %v3895_v24 = vmax.f32 %v3204_v29, %v3206_v30 }
  0xde   :  { %v3216_v35 = vpop.f32.mrb[2].mxu0  ;;  %v3218_v36 = vpop.f32.mrb[2].mxu1 }
  0xdf   :  { %v3222_v38 = vpop.f32.mrb[3].mxu0  ;;  %v3224_v39 = vpop.f32.mrb[3].mxu1 }
  0xe4   :  { %v3228_v41 = vpop.f32.mrb[4].mxu0  ;;  %v3230_v42 = vpop.f32.mrb[4].mxu1 }
  0xe5   :  { %v3234_v44 = vpop.f32.mrb[5].mxu0  ;;  %v3236_v45 = vpop.f32.mrb[5].mxu1 }
  0xe6   :  { %v3240_v47 = vpop.f32.mrb[6].mxu0  ;;  %v3242_v48 = vpop.f32.mrb[6].mxu1 }
  0xe7   :  { %v3246_v50 = vpop.f32.mrb[7].mxu0  ;;  %v3248_v51 = vpop.f32.mrb[7].mxu1 }
  0xec   :  { %v3252_v53 = vpop.f32.mrb[8].mxu0  ;;  %v3254_v54 = vpop.f32.mrb[8].mxu1 }
  0xed   :  { %v3258_v56 = vpop.f32.mrb[9].mxu0  ;;  %v3260_v57 = vpop.f32.mrb[9].mxu1 }
  0xee   :  { %v3264_v59 = vpop.f32.mrb[10].mxu0  ;;  %v3266_v60 = vpop.f32.mrb[10].mxu1 }
  0xef   :  { %v3270_v62 = vpop.f32.mrb[11].mxu0  ;;  %v3272_v63 = vpop.f32.mrb[11].mxu1 }
  0xf4   :  { %v3276_v1 = vpop.f32.mrb[12].mxu0  ;;  %v3278_v2 = vpop.f32.mrb[12].mxu1 }
  0xf5   :  { %v3282_v4 = vpop.f32.mrb[13].mxu0  ;;  %v3284_v5 = vpop.f32.mrb[13].mxu1 }
  0xf6   :  { %v3288_v7 = vpop.f32.mrb[14].mxu0  ;;  %v3290_v8 = vpop.f32.mrb[14].mxu1 }
  0xf7   :  { %v3294_v10 = vpop.f32.mrb[15].mxu0  ;;  %v3296_v11 = vpop.f32.mrb[15].mxu1 }
  0xfc   :  { %v3300_v13 = vpop.f32.mrb[16].mxu0  ;;  %v3302_v14 = vpop.f32.mrb[16].mxu1 }
  0xfd   :  { %v3306_v16 = vpop.f32.mrb[17].mxu0  ;;  %v3308_v17 = vpop.f32.mrb[17].mxu1 }
  0xfe   :  { %v3312_v19 = vpop.f32.mrb[18].mxu0  ;;  %v3314_v20 = vpop.f32.mrb[18].mxu1 }
  0xff   :  { %v3318_v22 = vpop.f32.mrb[19].mxu0  ;;  %v3320_v23 = vpop.f32.mrb[19].mxu1 }
 0x104   :  { %v3324_v25 = vpop.f32.mrb[20].mxu0  ;;  %v3326_v26 = vpop.f32.mrb[20].mxu1 }
 0x105   :  { %v3330_v28 = vpop.f32.mrb[21].mxu0  ;;  %v3332_v18 = vpop.f32.mrb[21].mxu1 }
 0x106   :  { %v3336_v15 = vpop.f32.mrb[22].mxu0  ;;  %v3338_v12 = vpop.f32.mrb[22].mxu1 }
 0x107   :  { %v3342_v9 = vpop.f32.mrb[23].mxu0  ;;  %v3344_v6 = vpop.f32.mrb[23].mxu1 }
 0x108   :  { %3856 = vst [vmem:[#allocation2_spill] sm:$0xff] %v3344_v6 }
 0x10c   :  { %v3348_v3 = vpop.f32.mrb[24].mxu0  ;;  %v3350_v0 = vpop.f32.mrb[24].mxu1 }
 0x10d   :  { %3857 = vst [vmem:[#allocation3_spill] sm:$0xff] %v3348_v3  ;;  %3858 = vst [vmem:[#allocation4_spill] sm:$0xff] %v3350_v0  ;;  %v3354_v61 = vpop.f32.mrb[25].mxu0  ;;  %v3356_v58 = vpop.f32.mrb[25].mxu1 }
 0x10e   :  { %3859 = vst [vmem:[#allocation5_spill] sm:$0xff] %v3354_v61  ;;  %3860 = vst [vmem:[#allocation6_spill] sm:$0xff] %v3356_v58  ;;  %v3360_v55 = vpop.f32.mrb[26].mxu0  ;;  %v3362_v52 = vpop.f32.mrb[26].mxu1 }
 0x10f   :  { %3861 = vst [vmem:[#allocation7_spill] sm:$0xff] %v3360_v55  ;;  %3862 = vst [vmem:[#allocation8_spill] sm:$0xff] %v3362_v52  ;;  %v3366_v49 = vpop.f32.mrb[27].mxu0  ;;  %v3368_v46 = vpop.f32.mrb[27].mxu1 }
 0x110   :  { %3863 = vst [vmem:[#allocation9_spill] sm:$0xff] %v3366_v49  ;;  %3864 = vst [vmem:[#allocation10_spill] sm:$0xff] %v3368_v46 }
 0x114   :  { %v3372_v43 = vpop.f32.mrb[28].mxu0  ;;  %v3374_v40 = vpop.f32.mrb[28].mxu1 }
 0x115   :  { %3865 = vst [vmem:[#allocation11_spill] sm:$0xff] %v3372_v43  ;;  %3866 = vst [vmem:[#allocation12_spill] sm:$0xff] %v3374_v40  ;;  %v3378_v37 = vpop.f32.mrb[29].mxu0  ;;  %v3380_v34 = vpop.f32.mrb[29].mxu1 }
 0x116   :  { %3867 = vst [vmem:[#allocation13_spill] sm:$0xff] %v3378_v37  ;;  %3868 = vst [vmem:[#allocation14_spill] sm:$0xff] %v3380_v34  ;;  %v3384_v31 = vpop.f32.mrb[30].mxu0  ;;  %v3386_v52 = vpop.f32.mrb[30].mxu1 }
 0x117   :  { %3869 = vst [vmem:[#allocation15_spill] sm:$0xff] %v3384_v31  ;;  %3870 = vst [vmem:[#allocation16_spill] sm:$0xff] %v3386_v52  ;;  %v3390_v46 = vpop.f32.mrb[31].mxu0  ;;  %v3392_v49 = vpop.f32.mrb[31].mxu1 }
 0x118   :  { %3871 = vst [vmem:[#allocation17_spill] sm:$0xff] %v3390_v46  ;;  %3872 = vst [vmem:[#allocation18_spill] sm:$0xff] %v3392_v49 }
 0x11c   :  { %v3396_v40 = vpop.f32.mrb[32].mxu0  ;;  %v3398_v43 = vpop.f32.mrb[32].mxu1 }
 0x11d   :  { %3873 = vst [vmem:[#allocation19_spill] sm:$0xff] %v3396_v40  ;;  %3874 = vst [vmem:[#allocation20_spill] sm:$0xff] %v3398_v43  ;;  %v3402_v34 = vpop.f32.mrb[33].mxu0  ;;  %v3404_v37 = vpop.f32.mrb[33].mxu1 }
 0x11e   :  { %3875 = vst [vmem:[#allocation21_spill] sm:$0xff] %v3402_v34  ;;  %3876 = vst [vmem:[#allocation22_spill] sm:$0xff] %v3404_v37  ;;  %v3408_v52 = vpop.f32.mrb[34].mxu0  ;;  %v3410_v31 = vpop.f32.mrb[34].mxu1 }
 0x11f   :  { %3877 = vst [vmem:[#allocation23_spill] sm:$0xff] %v3408_v52  ;;  %3878 = vst [vmem:[#allocation24_spill] sm:$0xff] %v3410_v31  ;;  %v3414_v49 = vpop.f32.mrb[35].mxu0  ;;  %v3416_v46 = vpop.f32.mrb[35].mxu1 }
 0x120   :  { %3879 = vst [vmem:[#allocation25_spill] sm:$0xff] %v3414_v49  ;;  %3880 = vst [vmem:[#allocation26_spill] sm:$0xff] %v3416_v46 }
 0x124   :  { %v3420_v43 = vpop.f32.mrb[36].mxu0  ;;  %v3422_v40 = vpop.f32.mrb[36].mxu1 }
 0x125   :  { %3881 = vst [vmem:[#allocation27_spill] sm:$0xff] %v3420_v43  ;;  %3882 = vst [vmem:[#allocation28_spill] sm:$0xff] %v3422_v40  ;;  %v3426_v37 = vpop.f32.mrb[37].mxu0  ;;  %v3428_v34 = vpop.f32.mrb[37].mxu1 }
 0x126   :  { %3883 = vst [vmem:[#allocation29_spill] sm:$0xff] %v3426_v37  ;;  %3884 = vst [vmem:[#allocation30_spill] sm:$0xff] %v3428_v34  ;;  %v3432_v31 = vpop.f32.mrb[38].mxu0  ;;  %v3434_v52 = vpop.f32.mrb[38].mxu1 }
 0x127   :  { %3885 = vst [vmem:[#allocation31_spill] sm:$0xff] %v3432_v31  ;;  %3886 = vst [vmem:[#allocation32_spill] sm:$0xff] %v3434_v52  ;;  %v3438_v46 = vpop.f32.mrb[39].mxu0  ;;  %v3440_v49 = vpop.f32.mrb[39].mxu1 }
 0x128   :  { %3887 = vst [vmem:[#allocation33_spill] sm:$0xff] %v3438_v46  ;;  %3888 = vst [vmem:[#allocation34_spill] sm:$0xff] %v3440_v49 }
 0x12c   :  { %v3444_v40 = vpop.f32.mrb[40].mxu0  ;;  %v3446_v43 = vpop.f32.mrb[40].mxu1 }
 0x12d   :  { %3889 = vst [vmem:[#allocation35_spill] sm:$0xff] %v3444_v40  ;;  %3890 = vst [vmem:[#allocation36_spill] sm:$0xff] %v3446_v43  ;;  %v3450_v34 = vpop.f32.mrb[41].mxu0  ;;  %v3452_v37 = vpop.f32.mrb[41].mxu1 }
 0x12e   :  { %3891 = vst [vmem:[#allocation37_spill] sm:$0xff] %v3450_v34  ;;  %3892 = vst [vmem:[#allocation38_spill] sm:$0xff] %v3452_v37  ;;  %v2584_v52 = vpop.f32.mrb[42].mxu0  ;;  %v2630_v31 = vpop.f32.mrb[42].mxu1 }
 0x12f   :  { %v3456_v55 = vpop.f32.mrb[43].mxu0  ;;  %v3458_v58 = vpop.f32.mrb[43].mxu1  ;;  %v3468_v52 = vld [vmem:[%s3815_s5] ss:$0 sm:$0xff]  ;;  %v3896_v31 = vmax.f32 %v3210_v32, %v3212_v33 }
 0x130   :  { %3893 = vst [vmem:[#allocation39_spill] sm:$0xff] %v3456_v55  ;;  %3894 = vst [vmem:[#allocation40_spill] sm:$0xff] %v3458_v58  ;;  %v3897_v58 = vmax.f32 %v3216_v35, %v3218_v36 }
 0x134   :  { %v2635_v49 = vpop.f32.mrb[44].mxu0  ;;  %v2681_v46 = vpop.f32.mrb[44].mxu1 }
 0x135   :  { %v1359_v43 = vmax.f32 %v3895_v24, %v2635_v49  ;;  %v1183_v40 = vpop.f32.mrb[45].mxu0  ;;  %v1651_v61 = vpop.f32.mrb[45].mxu1  ;;  %v3898_v24 = vmax.f32 %v3222_v38, %v3224_v39  ;;  %v3899_v38 = vmax.f32 %v3228_v41, %v3230_v42  ;;  %v3901_v41 = vmax.f32 %v3240_v47, %v3242_v48 }
 0x136   :  { %v1357_v27 = vmax.f32 %v3896_v31, %v1183_v40  ;;  %v2636_v37 = vpop.f32.mrb[46].mxu0  ;;  %v2682_v34 = vpop.f32.mrb[46].mxu1 }
 0x137   :  { %v1827_v21 = vmax.f32 %v1359_v43, %v2681_v46  ;;  %v1360_v55 = vmax.f32 %v3897_v58, %v2636_v37  ;;  %v1186_v29 = vpop.f32.mrb[47].mxu0  ;;  %v1654_v30 = vpop.f32.mrb[47].mxu1 }
 0x138   :  { %v1825_v49 = vmax.f32 %v1357_v27, %v1651_v61  ;;  %v1358_v0 = vmax.f32 %v3898_v24, %v1186_v29 }
 0x139   :  { %v1877_v3 = vadd.f32 %v3468_v52, %v1827_v21  ;;  %v1828_v6 = vmax.f32 %v1360_v55, %v2682_v34 }
 0x13a   :  { %v1875_v32 = vadd.f32 %v3468_v52, %v1825_v49  ;;  %v1826_v33 = vmax.f32 %v1358_v0, %v1654_v30  ;;  %v3900_v0 = vmax.f32 %v3234_v44, %v3236_v45 }
 0x13b   :  { %v1920_v40 = vmax.f32 %v1877_v3, 0.0  ;;  %v1878_v43 = vadd.f32 %v3468_v52, %v1828_v6 }
 0x13c   :  { %v1918_v46 = vmax.f32 %v1875_v32, 0.0  ;;  %v1876_v35 = vadd.f32 %v3468_v52, %v1826_v33  ;;  %v2639_v36 = vpop.f32.mrb[48].mxu0  ;;  %v2685_v37 = vpop.f32.mrb[48].mxu1  ;;  %v3902_v32 = vmax.f32 %v3246_v50, %v3248_v51 }
 0x13d   :  { %v2406_v58 = vpack.c.bf16 %v1920_v40, %v1920_v40  ;;  %v1921_v61 = vmax.f32 %v1878_v43, 0.0  ;;  %v1363_v39 = vmax.f32 %v3899_v38, %v2639_v36  ;;  %v1199_v21 = vpop.f32.mrb[49].mxu0  ;;  %v1667_v34 = vpop.f32.mrb[49].mxu1  ;;  %v3903_v38 = vmax.f32 %v3252_v53, %v3254_v54 }
 0x13e   :  { %v2404_v55 = vpack.c.bf16 %v1918_v46, %v1918_v46  ;;  %v1919_v27 = vmax.f32 %v1876_v35, 0.0  ;;  %v1361_v3 = vmax.f32 %v3900_v0, %v1199_v21  ;;  %v2640_v6 = vpop.f32.mrb[50].mxu0  ;;  %v2686_v31 = vpop.f32.mrb[50].mxu1  ;;  %v3904_v0 = vmax.f32 %v3258_v56, %v3260_v57 }
 0x13f   :  { %2137 = vst.msk [vmem:[%s3816_s6 + $0x8] sm:$0xf] %vm2134_vm3, %v2406_v58  ;;  %v2407_v29 = vpack.c.bf16 %v1921_v61, %v1921_v61  ;;  %v1831_v30 = vmax.f32 %v1363_v39, %v2685_v37  ;;  %v1364_v42 = vmax.f32 %v3901_v41, %v2640_v6  ;;  %v1202_v49 = vpop.f32.mrb[51].mxu0  ;;  %v1670_v24 = vpop.f32.mrb[51].mxu1  ;;  %v3905_v53 = vmax.f32 %v3264_v59, %v3266_v60 }
 0x140   :  { %2135 = vst.msk [vmem:[%s3816_s6] sm:$0xf] %vm2134_vm3, %v2404_v55  ;;  %v2405_v44 = vpack.c.bf16 %v1919_v27, %v1919_v27  ;;  %v1829_v45 = vmax.f32 %v1361_v3, %v1667_v34  ;;  %v1362_v33 = vmax.f32 %v3902_v32, %v1202_v49  ;;  %v3906_v49 = vmax.f32 %v3270_v62, %v3272_v63 }
 0x141   :  { %2138 = vst.msk [vmem:[%s3816_s6 + $0xc] sm:$0xf] %vm2134_vm3, %v2407_v29  ;;  %v1881_v47 = vadd.f32 %v3468_v52, %v1831_v30  ;;  %v1832_v48 = vmax.f32 %v1364_v42, %v2686_v31 }
 0x142   :  { %2136 = vst.msk [vmem:[%s3816_s6 + $0x4] sm:$0xf] %vm2134_vm3, %v2405_v44  ;;  %v1879_v40 = vadd.f32 %v3468_v52, %v1829_v45  ;;  %v1830_v43 = vmax.f32 %v1362_v33, %v1670_v24 }
 0x143   :  { %v1924_v46 = vmax.f32 %v1881_v47, 0.0  ;;  %v1882_v50 = vadd.f32 %v3468_v52, %v1832_v48 }
 0x144   :  { %v1922_v51 = vmax.f32 %v1879_v40, 0.0  ;;  %v1880_v35 = vadd.f32 %v3468_v52, %v1830_v43  ;;  %v2643_v36 = vpop.f32.mrb[52].mxu0  ;;  %v2689_v37 = vpop.f32.mrb[52].mxu1 }
 0x145   :  { %v2410_v58 = vpack.c.bf16 %v1924_v46, %v1924_v46  ;;  %v1925_v61 = vmax.f32 %v1882_v50, 0.0  ;;  %v1367_v39 = vmax.f32 %v3903_v38, %v2643_v36  ;;  %v1215_v21 = vpop.f32.mrb[53].mxu0  ;;  %v1683_v34 = vpop.f32.mrb[53].mxu1  ;;  %v3907_v46 = vmax.f32 %v3276_v1, %v3278_v2 }
 0x146   :  { %v2408_v55 = vpack.c.bf16 %v1922_v51, %v1922_v51  ;;  %v1923_v27 = vmax.f32 %v1880_v35, 0.0  ;;  %v1365_v3 = vmax.f32 %v3904_v0, %v1215_v21  ;;  %v2644_v6 = vpop.f32.mrb[54].mxu0  ;;  %v2690_v31 = vpop.f32.mrb[54].mxu1  ;;  %v3909_v1 = vmax.f32 %v3288_v7, %v3290_v8 }
 0x147   :  { %2141 = vst.msk [vmem:[%s3816_s6 + $0x18] sm:$0xf] %vm2134_vm3, %v2410_v58  ;;  %v2411_v29 = vpack.c.bf16 %v1925_v61, %v1925_v61  ;;  %v1835_v30 = vmax.f32 %v1367_v39, %v2689_v37  ;;  %v1368_v54 = vmax.f32 %v3905_v53, %v2644_v6  ;;  %v1218_v41 = vpop.f32.mrb[55].mxu0  ;;  %v1686_v42 = vpop.f32.mrb[55].mxu1  ;;  %v3908_v58 = vmax.f32 %v3282_v4, %v3284_v5 }
 0x148   :  { %2139 = vst.msk [vmem:[%s3816_s6 + $0x10] sm:$0xf] %vm2134_vm3, %v2408_v55  ;;  %v2409_v56 = vpack.c.bf16 %v1923_v27, %v1923_v27  ;;  %v1833_v57 = vmax.f32 %v1365_v3, %v1683_v34  ;;  %v1366_v24 = vmax.f32 %v3906_v49, %v1218_v41  ;;  %v3910_v0 = vmax.f32 %v3294_v10, %v3296_v11 }
 0x149   :  { %2142 = vst.msk [vmem:[%s3816_s6 + $0x1c] sm:$0xf] %vm2134_vm3, %v2411_v29  ;;  %v1885_v59 = vadd.f32 %v3468_v52, %v1835_v30  ;;  %v1836_v60 = vmax.f32 %v1368_v54, %v2690_v31 }
 0x14a   :  { %2140 = vst.msk [vmem:[%s3816_s6 + $0x14] sm:$0xf] %vm2134_vm3, %v2409_v56  ;;  %v1883_v44 = vadd.f32 %v3468_v52, %v1833_v57  ;;  %v1834_v45 = vmax.f32 %v1366_v24, %v1686_v42  ;;  %v3911_v56 = vmax.f32 %v3300_v13, %v3302_v14  ;;  %v3913_v13 = vmax.f32 %v3312_v19, %v3314_v20 }
 0x14b   :  { %v1928_v32 = vmax.f32 %v1885_v59, 0.0  ;;  %v1886_v62 = vadd.f32 %v3468_v52, %v1836_v60 }
 0x14c   :  { %v1926_v63 = vmax.f32 %v1883_v44, 0.0  ;;  %v1884_v33 = vadd.f32 %v3468_v52, %v1834_v45  ;;  %v2647_v47 = vpop.f32.mrb[56].mxu0  ;;  %v2693_v48 = vpop.f32.mrb[56].mxu1  ;;  %v3912_v44 = vmax.f32 %v3306_v16, %v3308_v17 }
 0x14d   :  { %v2414_v40 = vpack.c.bf16 %v1928_v32, %v1928_v32  ;;  %v1929_v43 = vmax.f32 %v1886_v62, 0.0  ;;  %v1371_v50 = vmax.f32 %v3907_v46, %v2647_v47  ;;  %v1231_v51 = vpop.f32.mrb[57].mxu0  ;;  %v1699_v35 = vpop.f32.mrb[57].mxu1 }
 0x14e   :  { %v2412_v36 = vpack.c.bf16 %v1926_v63, %v1926_v63  ;;  %v1927_v37 = vmax.f32 %v1884_v33, 0.0  ;;  %v1369_v61 = vmax.f32 %v3908_v58, %v1231_v51  ;;  %v2648_v38 = vpop.f32.mrb[58].mxu0  ;;  %v2694_v39 = vpop.f32.mrb[58].mxu1 }
 0x14f   :  { %2145 = vst.msk [vmem:[%s3816_s6 + $0x28] sm:$0xf] %vm2134_vm3, %v2414_v40  ;;  %v2415_v21 = vpack.c.bf16 %v1929_v43, %v1929_v43  ;;  %v1839_v34 = vmax.f32 %v1371_v50, %v2693_v48  ;;  %v1372_v2 = vmax.f32 %v3909_v1, %v2648_v38  ;;  %v1234_v55 = vpop.f32.mrb[59].mxu0  ;;  %v1702_v27 = vpop.f32.mrb[59].mxu1  ;;  %v3914_v40 = vmax.f32 %v3318_v22, %v3320_v23 }
 0x150   :  { %2143 = vst.msk [vmem:[%s3816_s6 + $0x20] sm:$0xf] %vm2134_vm3, %v2412_v36  ;;  %v2413_v4 = vpack.c.bf16 %v1927_v37, %v1927_v37  ;;  %v1837_v5 = vmax.f32 %v1369_v61, %v1699_v35  ;;  %v1370_v3 = vmax.f32 %v3910_v0, %v1234_v55  ;;  %v3915_v38 = vmax.f32 %v3324_v25, %v3326_v26 }
 0x151   :  { %2146 = vst.msk [vmem:[%s3816_s6 + $0x2c] sm:$0xf] %vm2134_vm3, %v2415_v21  ;;  %v1889_v7 = vadd.f32 %v3468_v52, %v1839_v34  ;;  %v1840_v8 = vmax.f32 %v1372_v2, %v2694_v39  ;;  %v3916_v55 = vmax.f32 %v3330_v28, %v3332_v18  ;;  %v3917_v25 = vmax.f32 %v3336_v15, %v3338_v12 }
 0x152   :  { %2144 = vst.msk [vmem:[%s3816_s6 + $0x24] sm:$0xf] %vm2134_vm3, %v2413_v4  ;;  %v1887_v6 = vadd.f32 %v3468_v52, %v1837_v5  ;;  %v1838_v31 = vmax.f32 %v1370_v3, %v1702_v27 }
 0x153   :  { %v1932_v29 = vmax.f32 %v1889_v7, 0.0  ;;  %v1890_v10 = vadd.f32 %v3468_v52, %v1840_v8 }
 0x154   :  { %v1930_v11 = vmax.f32 %v1887_v6, 0.0  ;;  %v1888_v30 = vadd.f32 %v3468_v52, %v1838_v31  ;;  %v2651_v53 = vpop.f32.mrb[60].mxu0  ;;  %v2697_v54 = vpop.f32.mrb[60].mxu1  ;;  %v3918_v6 = vld [vmem:[#allocation2_spill] sm:$0xff] }
 0x155   :  { %v2418_v41 = vpack.c.bf16 %v1932_v29, %v1932_v29  ;;  %v1933_v42 = vmax.f32 %v1890_v10, 0.0  ;;  %v1375_v57 = vmax.f32 %v3911_v56, %v2651_v53  ;;  %v1247_v49 = vpop.f32.mrb[61].mxu0  ;;  %v1715_v24 = vpop.f32.mrb[61].mxu1  ;;  %v3919_v31 = vmax.f32 %v3342_v9, %v3918_v6  ;;  %v3935_v6 = vld [vmem:[#allocation13_spill] sm:$0xff] }
 0x156   :  { %v2416_v59 = vpack.c.bf16 %v1930_v11, %v1930_v11  ;;  %v1931_v60 = vmax.f32 %v1888_v30, 0.0  ;;  %v1373_v45 = vmax.f32 %v3912_v44, %v1247_v49  ;;  %v2652_v32 = vpop.f32.mrb[62].mxu0  ;;  %v2698_v62 = vpop.f32.mrb[62].mxu1  ;;  %v3920_v49 = vld [vmem:[#allocation3_spill] sm:$0xff] }
 0x157   :  { %2149 = vst.msk [vmem:[%s3816_s6 + $0x38] sm:$0xf] %vm2134_vm3, %v2418_v41  ;;  %v2419_v63 = vpack.c.bf16 %v1933_v42, %v1933_v42  ;;  %v1843_v33 = vmax.f32 %v1375_v57, %v2697_v54  ;;  %v1376_v14 = vmax.f32 %v3913_v13, %v2652_v32  ;;  %v1250_v47 = vpop.f32.mrb[63].mxu0  ;;  %v1718_v48 = vpop.f32.mrb[63].mxu1 }
 0x158   :  { %2147 = vst.msk [vmem:[%s3816_s6 + $0x30] sm:$0xf] %vm2134_vm3, %v2416_v59  ;;  %v2417_v16 = vpack.c.bf16 %v1931_v60, %v1931_v60  ;;  %v1841_v17 = vmax.f32 %v1373_v45, %v1715_v24  ;;  %v1374_v43 = vmax.f32 %v3914_v40, %v1250_v47  ;;  %v3921_v24 = vld [vmem:[#allocation4_spill] sm:$0xff]  ;;  %v3926_v40 = vld [vmem:[#allocation7_spill] sm:$0xff] }
 0x159   :  { %2150 = vst.msk [vmem:[%s3816_s6 + $0x3c] sm:$0xf] %vm2134_vm3, %v2419_v63  ;;  %v1893_v19 = vadd.f32 %v3468_v52, %v1843_v33  ;;  %v1844_v20 = vmax.f32 %v1376_v14, %v2698_v62  ;;  %v3922_v59 = vmax.f32 %v3920_v49, %v3921_v24  ;;  %v3923_v63 = vld [vmem:[#allocation5_spill] sm:$0xff]  ;;  %v3924_v33 = vld [vmem:[#allocation6_spill] sm:$0xff] }
 0x15a   :  { %2148 = vst.msk [vmem:[%s3816_s6 + $0x34] sm:$0xf] %vm2134_vm3, %v2417_v16  ;;  %v1891_v46 = vadd.f32 %v3468_v52, %v1841_v17  ;;  %v1842_v50 = vmax.f32 %v1374_v43, %v1718_v48  ;;  %v3925_v13 = vmax.f32 %v3923_v63, %v3924_v33  ;;  %v3927_v43 = vld [vmem:[#allocation8_spill] sm:$0xff]  ;;  %v3941_v24 = vld [vmem:[#allocation17_spill] sm:$0xff] }
 0x15b   :  { %v1936_v51 = vmax.f32 %v1893_v19, 0.0  ;;  %v1894_v22 = vadd.f32 %v3468_v52, %v1844_v20  ;;  %v3928_v19 = vmax.f32 %v3926_v40, %v3927_v43  ;;  %v3944_v43 = vld [vmem:[#allocation19_spill] sm:$0xff] }
 0x15c   :  { %v1934_v23 = vmax.f32 %v1891_v46, 0.0  ;;  %v1892_v35 = vadd.f32 %v3468_v52, %v1842_v50  ;;  %v2655_v36 = vpop.f32.mrb[64].mxu0  ;;  %v2701_v37 = vpop.f32.mrb[64].mxu1 }
 0x15d   :  { %v2422_v58 = vpack.c.bf16 %v1936_v51, %v1936_v51  ;;  %v1937_v61 = vmax.f32 %v1894_v22, 0.0  ;;  %v1379_v39 = vmax.f32 %v3915_v38, %v2655_v36  ;;  %v1263_v21 = vpop.f32.mrb[65].mxu0  ;;  %v1731_v34 = vpop.f32.mrb[65].mxu1 }
 0x15e   :  { %v2420_v1 = vpack.c.bf16 %v1934_v23, %v1934_v23  ;;  %v1935_v2 = vmax.f32 %v1892_v35, 0.0  ;;  %v1377_v27 = vmax.f32 %v3916_v55, %v1263_v21  ;;  %v2656_v4 = vpop.f32.mrb[66].mxu0  ;;  %v2702_v5 = vpop.f32.mrb[66].mxu1  ;;  %v3929_v23 = vld [vmem:[#allocation9_spill] sm:$0xff]  ;;  %v3930_v35 = vld [vmem:[#allocation10_spill] sm:$0xff] }
 0x15f   :  { %2153 = vst.msk [vmem:[%s3816_s6 + $0x48] sm:$0xf] %vm2134_vm3, %v2422_v58  ;;  %v2423_v0 = vpack.c.bf16 %v1937_v61, %v1937_v61  ;;  %v1847_v3 = vmax.f32 %v1379_v39, %v2701_v37  ;;  %v1380_v26 = vmax.f32 %v3917_v25, %v2656_v4  ;;  %v1266_v7 = vpop.f32.mrb[67].mxu0  ;;  %v1734_v8 = vpop.f32.mrb[67].mxu1  ;;  %v3931_v36 = vmax.f32 %v3929_v23, %v3930_v35  ;;  %v3947_v35 = vld [vmem:[#allocation21_spill] sm:$0xff] }
 0x160   :  { %2151 = vst.msk [vmem:[%s3816_s6 + $0x40] sm:$0xf] %vm2134_vm3, %v2420_v1  ;;  %v2421_v18 = vpack.c.bf16 %v1935_v2, %v1935_v2  ;;  %v1845_v28 = vmax.f32 %v1377_v27, %v1731_v34  ;;  %v1378_v29 = vmax.f32 %v3919_v31, %v1266_v7  ;;  %v3936_v31 = vld [vmem:[#allocation14_spill] sm:$0xff] }
 0x161   :  { %2154 = vst.msk [vmem:[%s3816_s6 + $0x4c] sm:$0xf] %vm2134_vm3, %v2423_v0  ;;  %v1897_v12 = vadd.f32 %v3468_v52, %v1847_v3  ;;  %v1848_v15 = vmax.f32 %v1380_v26, %v2702_v5  ;;  %v3932_v0 = vld [vmem:[#allocation11_spill] sm:$0xff]  ;;  %v3933_v3 = vld [vmem:[#allocation12_spill] sm:$0xff] }
 0x162   :  { %2152 = vst.msk [vmem:[%s3816_s6 + $0x44] sm:$0xf] %vm2134_vm3, %v2421_v18  ;;  %v1895_v10 = vadd.f32 %v3468_v52, %v1845_v28  ;;  %v1846_v11 = vmax.f32 %v1378_v29, %v1734_v8  ;;  %v3934_v25 = vmax.f32 %v3932_v0, %v3933_v3  ;;  %v3937_v29 = vmax.f32 %v3935_v6, %v3936_v31  ;;  %v3953_v3 = vld [vmem:[#allocation25_spill] sm:$0xff] }
 0x163   :  { %v1940_v30 = vmax.f32 %v1897_v12, 0.0  ;;  %v1898_v9 = vadd.f32 %v3468_v52, %v1848_v15 }
 0x164   :  { %v1938_v53 = vmax.f32 %v1895_v10, 0.0  ;;  %v1896_v54 = vadd.f32 %v3468_v52, %v1846_v11  ;;  %v2659_v41 = vpop.f32.mrb[68].mxu0  ;;  %v2705_v42 = vpop.f32.mrb[68].mxu1 }
 0x165   :  { %v2426_v56 = vpack.c.bf16 %v1940_v30, %v1940_v30  ;;  %v1941_v57 = vmax.f32 %v1898_v9, 0.0  ;;  %v1383_v60 = vmax.f32 %v3922_v59, %v2659_v41  ;;  %v1279_v44 = vpop.f32.mrb[69].mxu0  ;;  %v1747_v45 = vpop.f32.mrb[69].mxu1  ;;  %v3938_v9 = vld [vmem:[#allocation15_spill] sm:$0xff]  ;;  %v3942_v59 = vld [vmem:[#allocation18_spill] sm:$0xff] }
 0x166   :  { %v2424_v32 = vpack.c.bf16 %v1938_v53, %v1938_v53  ;;  %v1939_v62 = vmax.f32 %v1896_v54, 0.0  ;;  %v1381_v14 = vmax.f32 %v3925_v13, %v1279_v44  ;;  %v2660_v47 = vpop.f32.mrb[70].mxu0  ;;  %v2706_v48 = vpop.f32.mrb[70].mxu1  ;;  %v3939_v53 = vld [vmem:[#allocation16_spill] sm:$0xff] }
 0x167   :  { %2157 = vst.msk [vmem:[%s3816_s6 + $0x58] sm:$0xf] %vm2134_vm3, %v2426_v56  ;;  %v2427_v16 = vpack.c.bf16 %v1941_v57, %v1941_v57  ;;  %v1851_v17 = vmax.f32 %v1383_v60, %v2705_v42  ;;  %v1384_v20 = vmax.f32 %v3928_v19, %v2660_v47  ;;  %v1282_v46 = vpop.f32.mrb[71].mxu0  ;;  %v1750_v50 = vpop.f32.mrb[71].mxu1  ;;  %v3940_v54 = vmax.f32 %v3938_v9, %v3939_v53  ;;  %v3945_v19 = vld [vmem:[#allocation20_spill] sm:$0xff]  ;;  %v3956_v53 = vld [vmem:[#allocation27_spill] sm:$0xff] }
 0x168   :  { %2155 = vst.msk [vmem:[%s3816_s6 + $0x50] sm:$0xf] %vm2134_vm3, %v2424_v32  ;;  %v2425_v51 = vpack.c.bf16 %v1939_v62, %v1939_v62  ;;  %v1849_v22 = vmax.f32 %v1381_v14, %v1747_v45  ;;  %v1382_v37 = vmax.f32 %v3931_v36, %v1282_v46  ;;  %v3943_v60 = vmax.f32 %v3941_v24, %v3942_v59  ;;  %v3948_v36 = vld [vmem:[#allocation22_spill] sm:$0xff]  ;;  %v3959_v59 = vld [vmem:[#allocation29_spill] sm:$0xff] }
 0x169   :  { %2158 = vst.msk [vmem:[%s3816_s6 + $0x5c] sm:$0xf] %vm2134_vm3, %v2427_v16  ;;  %v1901_v58 = vadd.f32 %v3468_v52, %v1851_v17  ;;  %v1852_v61 = vmax.f32 %v1384_v20, %v2706_v48  ;;  %v3946_v20 = vmax.f32 %v3944_v43, %v3945_v19  ;;  %v3965_v19 = vld [vmem:[#allocation33_spill] sm:$0xff] }
 0x16a   :  { %2156 = vst.msk [vmem:[%s3816_s6 + $0x54] sm:$0xf] %vm2134_vm3, %v2425_v51  ;;  %v1899_v38 = vadd.f32 %v3468_v52, %v1849_v22  ;;  %v1850_v39 = vmax.f32 %v1382_v37, %v1750_v50  ;;  %v3949_v37 = vmax.f32 %v3947_v35, %v3948_v36 }
 0x16b   :  { %v1944_v21 = vmax.f32 %v1901_v58, 0.0  ;;  %v1902_v34 = vadd.f32 %v3468_v52, %v1852_v61 }
 0x16c   :  { %v1942_v1 = vmax.f32 %v1899_v38, 0.0  ;;  %v1900_v2 = vadd.f32 %v3468_v52, %v1850_v39  ;;  %v2663_v55 = vpop.f32.mrb[72].mxu0  ;;  %v2709_v27 = vpop.f32.mrb[72].mxu1 }
 0x16d   :  { %v2430_v4 = vpack.c.bf16 %v1944_v21, %v1944_v21  ;;  %v1945_v5 = vmax.f32 %v1902_v34, 0.0  ;;  %v1387_v26 = vmax.f32 %v3934_v25, %v2663_v55  ;;  %v1295_v7 = vpop.f32.mrb[73].mxu0  ;;  %v1763_v8 = vpop.f32.mrb[73].mxu1  ;;  %v3950_v34 = vld [vmem:[#allocation23_spill] sm:$0xff]  ;;  %v3954_v25 = vld [vmem:[#allocation26_spill] sm:$0xff] }
 0x16e   :  { %v2428_v18 = vpack.c.bf16 %v1942_v1, %v1942_v1  ;;  %v1943_v28 = vmax.f32 %v1900_v2, 0.0  ;;  %v1385_v12 = vmax.f32 %v3937_v29, %v1295_v7  ;;  %v2664_v15 = vpop.f32.mrb[74].mxu0  ;;  %v2710_v10 = vpop.f32.mrb[74].mxu1  ;;  %v3951_v1 = vld [vmem:[#allocation24_spill] sm:$0xff] }
 0x16f   :  { %2161 = vst.msk [vmem:[%s3816_s6 + $0x68] sm:$0xf] %vm2134_vm3, %v2430_v4  ;;  %v2431_v11 = vpack.c.bf16 %v1945_v5, %v1945_v5  ;;  %v1855_v30 = vmax.f32 %v1387_v26, %v2709_v27  ;;  %v1388_v41 = vmax.f32 %v3940_v54, %v2664_v15  ;;  %v1298_v42 = vpop.f32.mrb[75].mxu0  ;;  %v1766_v56 = vpop.f32.mrb[75].mxu1  ;;  %v3952_v2 = vmax.f32 %v3950_v34, %v3951_v1  ;;  %v3957_v54 = vld [vmem:[#allocation28_spill] sm:$0xff]  ;;  %v3968_v1 = vld [vmem:[#allocation35_spill] sm:$0xff] }
 0x170   :  { %2159 = vst.msk [vmem:[%s3816_s6 + $0x60] sm:$0xf] %vm2134_vm3, %v2428_v18  ;;  %v2429_v57 = vpack.c.bf16 %v1943_v28, %v1943_v28  ;;  %v1853_v49 = vmax.f32 %v1385_v12, %v1763_v8  ;;  %v1386_v44 = vmax.f32 %v3943_v60, %v1298_v42  ;;  %v3955_v26 = vmax.f32 %v3953_v3, %v3954_v25  ;;  %v3960_v60 = vld [vmem:[#allocation30_spill] sm:$0xff]  ;;  %v3971_v25 = vld [vmem:[#allocation37_spill] sm:$0xff] }
 0x171   :  { %2162 = vst.msk [vmem:[%s3816_s6 + $0x6c] sm:$0xf] %vm2134_vm3, %v2431_v11  ;;  %v1905_v45 = vadd.f32 %v3468_v52, %v1855_v30  ;;  %v1856_v32 = vmax.f32 %v1388_v41, %v2710_v10  ;;  %v3958_v41 = vmax.f32 %v3956_v53, %v3957_v54 }
 0x172   :  { %2160 = vst.msk [vmem:[%s3816_s6 + $0x64] sm:$0xf] %vm2134_vm3, %v2429_v57  ;;  %v1903_v62 = vadd.f32 %v3468_v52, %v1853_v49  ;;  %v1854_v63 = vmax.f32 %v1386_v44, %v1766_v56  ;;  %v3961_v44 = vmax.f32 %v3959_v59, %v3960_v60 }
 0x173   :  { %v1948_v33 = vmax.f32 %v1905_v45, 0.0  ;;  %v1906_v13 = vadd.f32 %v3468_v52, %v1856_v32 }
 0x174   :  { %v1946_v14 = vmax.f32 %v1903_v62, 0.0  ;;  %v1904_v47 = vadd.f32 %v3468_v52, %v1854_v63  ;;  %v2667_v48 = vpop.f32.mrb[76].mxu0  ;;  %v2713_v16 = vpop.f32.mrb[76].mxu1 }
 0x175   :  { %v2434_v17 = vpack.c.bf16 %v1948_v33, %v1948_v33  ;;  %v1949_v40 = vmax.f32 %v1906_v13, 0.0  ;;  %v1391_v46 = vmax.f32 %v3946_v20, %v2667_v48  ;;  %v1311_v50 = vpop.f32.mrb[77].mxu0  ;;  %v1779_v51 = vpop.f32.mrb[77].mxu1  ;;  %v3962_v13 = vld [vmem:[#allocation31_spill] sm:$0xff]  ;;  %v3966_v20 = vld [vmem:[#allocation34_spill] sm:$0xff] }
 0x176   :  { %v2432_v22 = vpack.c.bf16 %v1946_v14, %v1946_v14  ;;  %v1947_v23 = vmax.f32 %v1904_v47, 0.0  ;;  %v1389_v58 = vmax.f32 %v3949_v37, %v1311_v50  ;;  %v2668_v61 = vpop.f32.mrb[78].mxu0  ;;  %v2714_v38 = vpop.f32.mrb[78].mxu1  ;;  %v3963_v14 = vld [vmem:[#allocation32_spill] sm:$0xff] }
 0x177   :  { %2165 = vst.msk [vmem:[%s3816_s6 + $0x78] sm:$0xf] %vm2134_vm3, %v2434_v17  ;;  %v2435_v39 = vpack.c.bf16 %v1949_v40, %v1949_v40  ;;  %v1859_v21 = vmax.f32 %v1391_v46, %v2713_v16  ;;  %v1392_v55 = vmax.f32 %v3952_v2, %v2668_v61  ;;  %v1314_v27 = vpop.f32.mrb[79].mxu0  ;;  %v1782_v4 = vpop.f32.mrb[79].mxu1  ;;  %v3964_v47 = vmax.f32 %v3962_v13, %v3963_v14  ;;  %v3969_v2 = vld [vmem:[#allocation36_spill] sm:$0xff] }
 0x178   :  { %2163 = vst.msk [vmem:[%s3816_s6 + $0x70] sm:$0xf] %vm2134_vm3, %v2432_v22  ;;  %v2433_v5 = vpack.c.bf16 %v1947_v23, %v1947_v23  ;;  %v1857_v0 = vmax.f32 %v1389_v58, %v1779_v51  ;;  %v1390_v7 = vmax.f32 %v3955_v26, %v1314_v27  ;;  %v3967_v46 = vmax.f32 %v3965_v19, %v3966_v20  ;;  %v3972_v26 = vld [vmem:[#allocation38_spill] sm:$0xff] }
 0x179   :  { %2166 = vst.msk [vmem:[%s3816_s6 + $0x7c] sm:$0xf] %vm2134_vm3, %v2435_v39  ;;  %v1909_v8 = vadd.f32 %v3468_v52, %v1859_v21  ;;  %v1860_v18 = vmax.f32 %v1392_v55, %v2714_v38  ;;  %v3970_v55 = vmax.f32 %v3968_v1, %v3969_v2 }
 0x17a   :  { %2164 = vst.msk [vmem:[%s3816_s6 + $0x74] sm:$0xf] %vm2134_vm3, %v2433_v5  ;;  %v1907_v28 = vadd.f32 %v3468_v52, %v1857_v0  ;;  %v1858_v6 = vmax.f32 %v1390_v7, %v1782_v4  ;;  %v3973_v7 = vmax.f32 %v3971_v25, %v3972_v26 }
 0x17b   :  { %v1952_v31 = vmax.f32 %v1909_v8, 0.0  ;;  %v1910_v29 = vadd.f32 %v3468_v52, %v1860_v18 }
 0x17c   :  { %v1950_v12 = vmax.f32 %v1907_v28, 0.0  ;;  %v1908_v15 = vadd.f32 %v3468_v52, %v1858_v6  ;;  %v2671_v10 = vpop.f32.mrb[80].mxu0  ;;  %v2717_v11 = vpop.f32.mrb[80].mxu1 }
 0x17d   :  { %v2438_v30 = vpack.c.bf16 %v1952_v31, %v1952_v31  ;;  %v1953_v9 = vmax.f32 %v1910_v29, 0.0  ;;  %v1395_v42 = vmax.f32 %v3958_v41, %v2671_v10  ;;  %v1327_v56 = vpop.f32.mrb[81].mxu0  ;;  %v1795_v57 = vpop.f32.mrb[81].mxu1 }
 0x17e   :  { %v2436_v49 = vpack.c.bf16 %v1950_v12, %v1950_v12  ;;  %v1951_v24 = vmax.f32 %v1908_v15, 0.0  ;;  %v1393_v45 = vmax.f32 %v3961_v44, %v1327_v56  ;;  %v2672_v32 = vpop.f32.mrb[82].mxu0  ;;  %v2718_v62 = vpop.f32.mrb[82].mxu1 }
 0x17f   :  { %2169 = vst.msk [vmem:[%s3816_s6 + $0x88] sm:$0xf] %vm2134_vm3, %v2438_v30  ;;  %v2439_v63 = vpack.c.bf16 %v1953_v9, %v1953_v9  ;;  %v1863_v33 = vmax.f32 %v1395_v42, %v2717_v11  ;;  %v1396_v48 = vmax.f32 %v3964_v47, %v2672_v32  ;;  %v1330_v16 = vpop.f32.mrb[83].mxu0  ;;  %v1798_v17 = vpop.f32.mrb[83].mxu1  ;;  %v3974_v11 = vld [vmem:[#allocation39_spill] sm:$0xff]  ;;  %v3975_v30 = vld [vmem:[#allocation40_spill] sm:$0xff] }
 0x180   :  { %2167 = vst.msk [vmem:[%s3816_s6 + $0x80] sm:$0xf] %vm2134_vm3, %v2436_v49  ;;  %v2437_v40 = vpack.c.bf16 %v1951_v24, %v1951_v24  ;;  %v1861_v43 = vmax.f32 %v1393_v45, %v1795_v57  ;;  %v1394_v50 = vmax.f32 %v3967_v46, %v1330_v16  ;;  %v3976_v9 = vmax.f32 %v3974_v11, %v3975_v30 }
 0x181   :  { %2170 = vst.msk [vmem:[%s3816_s6 + $0x8c] sm:$0xf] %vm2134_vm3, %v2439_v63  ;;  %v1913_v51 = vadd.f32 %v3468_v52, %v1863_v33  ;;  %v1864_v22 = vmax.f32 %v1396_v48, %v2718_v62 }
 0x182   :  { %2168 = vst.msk [vmem:[%s3816_s6 + $0x84] sm:$0xf] %vm2134_vm3, %v2437_v40  ;;  %v1911_v23 = vadd.f32 %v3468_v52, %v1861_v43  ;;  %v1862_v35 = vmax.f32 %v1394_v50, %v1798_v17 }
 0x183   :  { %v1956_v36 = vmax.f32 %v1913_v51, 0.0  ;;  %v1914_v37 = vadd.f32 %v3468_v52, %v1864_v22 }
 0x184   :  { %v1954_v58 = vmax.f32 %v1911_v23, 0.0  ;;  %v1912_v61 = vadd.f32 %v3468_v52, %v1862_v35  ;;  %v2675_v38 = vpop.f32.mrb[84].mxu0  ;;  %v2721_v39 = vpop.f32.mrb[84].mxu1 }
 0x185   :  { %v2442_v21 = vpack.c.bf16 %v1956_v36, %v1956_v36  ;;  %v1957_v34 = vmax.f32 %v1914_v37, 0.0  ;;  %v1399_v27 = vmax.f32 %v3970_v55, %v2675_v38  ;;  %v1343_v4 = vpop.f32.mrb[85].mxu0  ;;  %v1811_v5 = vpop.f32.mrb[85].mxu1 }
 0x186   :  { %v2440_v0 = vpack.c.bf16 %v1954_v58, %v1954_v58  ;;  %v1955_v3 = vmax.f32 %v1912_v61, 0.0  ;;  %v1397_v8 = vmax.f32 %v3973_v7, %v1343_v4  ;;  %v2676_v18 = vpop.f32.mrb[86].mxu0  ;;  %v2722_v28 = vpop.f32.mrb[86].mxu1 }
 0x187   :  { %2173 = vst.msk [vmem:[%s3816_s6 + $0x98] sm:$0xf] %vm2134_vm3, %v2442_v21  ;;  %v2443_v6 = vpack.c.bf16 %v1957_v34, %v1957_v34  ;;  %v1867_v31 = vmax.f32 %v1399_v27, %v2721_v39  ;;  %v1346_v29 = vpop.f32.mrb[87].mxu0  ;;  %v1814_v12 = vpop.f32.mrb[87].mxu1 }
 0x188   :  { %2171 = vst.msk [vmem:[%s3816_s6 + $0x90] sm:$0xf] %vm2134_vm3, %v2440_v0  ;;  %v2441_v15 = vpack.c.bf16 %v1955_v3, %v1955_v3  ;;  %v1865_v10 = vmax.f32 %v1397_v8, %v1811_v5  ;;  %v1398_v53 = vmax.f32 %v3976_v9, %v1346_v29 }
 0x189   :  { %2174 = vst.msk [vmem:[%s3816_s6 + $0x9c] sm:$0xf] %vm2134_vm3, %v2443_v6  ;;  %v1917_v54 = vadd.f32 %v3468_v52, %v1867_v31 }
 0x18a   :  { %2172 = vst.msk [vmem:[%s3816_s6 + $0x94] sm:$0xf] %vm2134_vm3, %v2441_v15  ;;  %v1915_v41 = vadd.f32 %v3468_v52, %v1865_v10  ;;  %v1866_v42 = vmax.f32 %v1398_v53, %v1814_v12 }
 0x18b   :  { %v1960_v56 = vmax.f32 %v1917_v54, 0.0 }
 0x18c   :  { %v1958_v57 = vmax.f32 %v1915_v41, 0.0  ;;  %v1916_v49 = vadd.f32 %v3468_v52, %v1866_v42 }
 0x18d   :  { %v2446_v24 = vpack.c.bf16 %v1960_v56, %v1960_v56 }
 0x18e   :  { %v2444_v59 = vpack.c.bf16 %v1958_v57, %v1958_v57  ;;  %v1959_v60 = vmax.f32 %v1916_v49, 0.0 }
 0x18f   :  { %2178 = vst.msk [vmem:[%s3816_s6 + $0xa8] sm:$0x1] %vm2177_vm4, %v2446_v24 }
 0x190   :  { %2175 = vst.msk [vmem:[%s3816_s6 + $0xa0] sm:$0xf] %vm2134_vm3, %v2444_v59  ;;  %v2445_v44 = vpack.c.bf16 %v1959_v60, %v1959_v60 }
 0x192   :  { %2176 = vst.msk [vmem:[%s3816_s6 + $0xa4] sm:$0xf] %vm2134_vm3, %v2445_v44 }

// kernel: net_forward.4
= control target key start
LH: loop header
LB: loop body
LE: loop exit
PB: predicated region body
PF: predicated region fallthrough
CT: control target
= control target key end

     0   :  { %vm237_vm0 = vcmask 261120   ;;  %vm1076_vm1 = vcmask 519168   ;;  %vm1083_vm2 = vcmask 516096   ;;  %s1912_s4 = inlined_call_operand.vmem [shape: bf16[288,64], index: 4, kind: input, shape index: {}]   ;;  %s1913_s0 = inlined_call_operand.vmem [shape: bf16[50,288], index: 0, kind: input, shape index: {}]   ;;  %s1914_s1 = inlined_call_operand.vmem [shape: bf16[50,288], index: 1, kind: input, shape index: {}]   ;;  %s1915_s2 = inlined_call_operand.vmem [shape: bf16[50,288], index: 2, kind: input, shape index: {}]   ;;  %s1916_s3 = inlined_call_operand.vmem [shape: bf16[50,288], index: 3, kind: input, shape index: {}]   ;;  %s1917_s5 = inlined_call_operand.vmem [shape: f32[1,64], index: 5, kind: input, shape index: {}]   ;;  %s1918_s6 = inlined_call_operand.vmem [shape: bf16[50,64], index: 6, kind: output, shape index: {}]  }
   0x1   :  { %v1534_v0 = vld [vmem:[%s1912_s4 + $0x40] sm:$0xff]   ;;  %v1546_v2 = vld [vmem:[%s1912_s4 + $0x48] sm:$0xff]   ;;  %v1560_v4 = vld [vmem:[%s1912_s4 + $0x50] sm:$0xff]  }
   0x2   :  { %v1539_v1 = vld [vmem:[%s1912_s4] sm:$0xff]   ;;  %1186 = vmatprep.subr.bf16.mxu0 %v1534_v0  ;;  %1232 = vmatprep.subr.bf16.mxu1 %v1534_v0  ;;  %v1553_v3 = vld [vmem:[%s1912_s4 + $0x8] sm:$0xff]   ;;  %v1567_v5 = vld [vmem:[%s1912_s4 + $0x10] sm:$0xff]  }
   0x3   :  { %1187 = vmatpush3.bf16.msra.mxu0 %v1539_v1  ;;  %1233 = vmatpush3.bf16.msra.mxu1 %v1539_v1  ;;  %v1574_v6 = vld [vmem:[%s1912_s4 + $0x58] sm:$0xff]   ;;  %v1588_v8 = vld [vmem:[%s1912_s4 + $0x60] sm:$0xff]   ;;  %v1602_v10 = vld [vmem:[%s1912_s4 + $0x68] sm:$0xff]  }
   0x4   :  { %1188 = vmatprep.subr.bf16.mxu0 %v1546_v2  ;;  %1234 = vmatprep.subr.bf16.mxu1 %v1546_v2  ;;  %v1581_v7 = vld [vmem:[%s1912_s4 + $0x18] sm:$0xff]   ;;  %v1595_v9 = vld [vmem:[%s1912_s4 + $0x20] sm:$0xff]   ;;  %v1615_v13 = vld [vmem:[%s1912_s4 + $0x28] sm:$0xff]  }
   0x5   :  { %v1436_v11 = vld [vmem:[%s1913_s0 + $0x4] ss:$12 sps:$4 sm:$0xff]   ;;  %v1636_v16 = vld [vmem:[%s1912_s4 + $0x78] sm:$0xff]   ;;  %v1434_v19 = vld [vmem:[%s1913_s0] ss:$12 sps:$4 sm:$0xff]  }
   0x6   :  { %v1439_v12 = vld [vmem:[%s1914_s1 + $0x4] ss:$12 sps:$4 sm:$0xff]   ;;  %282 = vmatprep.mubr.bf16.mxu0 %v1436_v11  ;;  %v1643_v17 = vld [vmem:[%s1912_s4 + $0x38] sm:$0xff]   ;;  %v1437_v20 = vld [vmem:[%s1914_s1] ss:$12 sps:$4 sm:$0xff]  }
   0x7   :  { %1189 = vmatpush3.bf16.msra.mxu0 %v1553_v3  ;;  %1235 = vmatpush3.bf16.msra.mxu1 %v1553_v3  ;;  %v1622_v14 = vld [vmem:[%s1912_s4 + $0x70] sm:$0xff]   ;;  %v1650_v18 = vld [vmem:[%s1912_s4 + $0x80] sm:$0xff]   ;;  %v1441_v21 = vld [vmem:[%s1913_s0 + $0x1c] ss:$12 sps:$4 sm:$0xff]  }
   0x8   :  { %1190 = vmatprep.subr.bf16.mxu0 %v1560_v4  ;;  %1236 = vmatprep.subr.bf16.mxu1 %v1560_v4  ;;  %v1629_v15 = vld [vmem:[%s1912_s4 + $0x30] sm:$0xff]   ;;  %v1443_v22 = vld [vmem:[%s1914_s1 + $0x1c] ss:$12 sps:$4 sm:$0xff]   ;;  %v1445_v24 = vld [vmem:[%s1913_s0 + $0x18] ss:$12 sps:$4 sm:$0xff]  }
   0x9   :  { %491 = vmatprep.mubr.bf16.mxu1 %v1439_v12  ;;  %v1671_v23 = vld [vmem:[%s1912_s4 + $0x88] sm:$0xff]   ;;  %v1446_v25 = vld [vmem:[%s1914_s1 + $0x18] ss:$12 sps:$4 sm:$0xff]   ;;  %v1447_v26 = vld [vmem:[%s1913_s0 + $0x34] ss:$12 sps:$4 sm:$0xff]  }
   0xa   :  { %v1449_v27 = vld [vmem:[%s1914_s1 + $0x34] ss:$12 sps:$4 sm:$0xff]   ;;  %v72_v28 = vld [vmem:[%s1913_s0 + $0x48] sm:$0x11]  ;;  %v1451_v30 = vld [vmem:[%s1913_s0 + $0x30] ss:$12 sps:$4 sm:$0xff]  }
   0xb   :  { %1191 = vmatpush3.bf16.msra.mxu0 %v1567_v5  ;;  %1237 = vmatpush3.bf16.msra.mxu1 %v1567_v5  ;;  %v390_v29 = vld [vmem:[%s1914_s1 + $0x48] sm:$0x11]  ;;  %v1453_v31 = vld [vmem:[%s1914_s1 + $0x30] ss:$12 sps:$4 sm:$0xff]   ;;  %v1099_v32 = vcombine.high %v72_v28, %v72_v28  ;;  %v1098_v34 = vcombine.low %v72_v28, %v72_v28  ;;  %v1463_v40 = vld [vmem:[%s1913_s0 + $0x38] ss:$12 sps:$4 sm:$0xff]  }
   0xc   :  { %1192 = vmatprep.subr.bf16.mxu0 %v1574_v6  ;;  %1238 = vmatprep.subr.bf16.mxu1 %v1574_v6  ;;  %v1133_v33 = vcombine.high %v390_v29, %v390_v29  ;;  %v1132_v35 = vcombine.low %v390_v29, %v390_v29  ;;  %v1458_v36 = vld [vmem:[%s1913_s0 + $0x8] ss:$12 sps:$4 sm:$0xff]   ;;  %v1461_v37 = vld [vmem:[%s1915_s2 + $0x4] ss:$12 sps:$4 sm:$0xff]   ;;  %v1459_v38 = vld [vmem:[%s1915_s2] ss:$12 sps:$4 sm:$0xff]  }
   0xd   :  { %v1462_v39 = vld [vmem:[%s1913_s0 + $0x20] ss:$12 sps:$4 sm:$0xff]   ;;  %v1464_v41 = vld [vmem:[%s1915_s2 + $0x1c] ss:$12 sps:$4 sm:$0xff]   ;;  %v1467_v43 = vld [vmem:[%s1915_s2 + $0x18] ss:$12 sps:$4 sm:$0xff]  }
   0xe   :  { %v1466_v42 = vld [vmem:[%s1913_s0 + $0x50] ss:$0 sps:$4 sm:$0x11]   ;;  %v1468_v44 = vld [vmem:[%s1914_s1 + $0x8] ss:$12 sps:$4 sm:$0xff]  }
   0xf   :  { %1193 = vmatpush3.bf16.msra.mxu0 %v1581_v7  ;;  %1239 = vmatpush3.bf16.msra.mxu1 %v1581_v7  ;;  %v1469_v45 = vld [vmem:[%s1915_s2 + $0x34] ss:$12 sps:$4 sm:$0xff]   ;;  %v1472_v47 = vld [vmem:[%s1915_s2 + $0x30] ss:$12 sps:$4 sm:$0xff]   ;;  %v606_v48 = vld [vmem:[%s1915_s2 + $0x48] sm:$0x11] }
  0x10   :  { %1194 = vmatprep.subr.bf16.mxu0 %v1588_v8  ;;  %1240 = vmatprep.subr.bf16.mxu1 %v1588_v8  ;;  %v1471_v46 = vld [vmem:[%s1914_s1 + $0x20] ss:$12 sps:$4 sm:$0xff]   ;;  %v1473_v49 = vld [vmem:[%s1914_s1 + $0x38] ss:$12 sps:$4 sm:$0xff]   ;;  %v1149_v50 = vcombine.high %v606_v48, %v606_v48  ;;  %v1148_v52 = vcombine.low %v606_v48, %v606_v48  ;;  %v1477_v53 = vld [vmem:[%s1915_s2 + $0x8] ss:$12 sps:$4 sm:$0xff]  }
  0x11   :  { %v1475_v51 = vld [vmem:[%s1914_s1 + $0x50] ss:$0 sps:$4 sm:$0x11]   ;;  %v1478_v55 = vld [vmem:[%s1916_s3] ss:$12 sps:$4 sm:$0xff]  }
  0x12   :  { %v1480_v54 = vld [vmem:[%s1916_s3 + $0x4] ss:$12 sps:$4 sm:$0xff]   ;;  %v1481_v56 = vld [vmem:[%s1915_s2 + $0x20] ss:$12 sps:$4 sm:$0xff]   ;;  %v1483_v58 = vld [vmem:[%s1916_s3 + $0x1c] ss:$12 sps:$4 sm:$0xff]  }
  0x13   :  { %1195 = vmatpush3.bf16.msra.mxu0 %v1595_v9  ;;  %1241 = vmatpush3.bf16.msra.mxu1 %v1595_v9  ;;  %v1482_v57 = vld [vmem:[%s1915_s2 + $0x38] ss:$12 sps:$4 sm:$0xff]   ;;  %v1485_v59 = vld [vmem:[%s1915_s2 + $0x50] ss:$0 sps:$4 sm:$0x11]  }
  0x14   :  { %1196 = vmatprep.subr.bf16.mxu0 %v1602_v10  ;;  %1242 = vmatprep.subr.bf16.mxu1 %v1602_v10  ;;  %v1486_v60 = vld [vmem:[%s1916_s3 + $0x18] ss:$12 sps:$4 sm:$0xff]   ;;  %v1487_v61 = vld [vmem:[%s1916_s3 + $0x34] ss:$12 sps:$4 sm:$0xff]   ;;  %v822_v63 = vld [vmem:[%s1916_s3 + $0x48] sm:$0x11] }
  0x15   :  { %v1489_v62 = vld [vmem:[%s1916_s3 + $0x8] ss:$12 sps:$4 sm:$0xff]  }
  0x17   :  { %1197 = vmatpush3.bf16.msra.mxu0 %v1615_v13  ;;  %1243 = vmatpush3.bf16.msra.mxu1 %v1615_v13 }
  0x18   :  { %1198 = vmatprep.subr.bf16.mxu0 %v1622_v14  ;;  %1244 = vmatprep.subr.bf16.mxu1 %v1622_v14 }
  0x1b   :  { %1199 = vmatpush3.bf16.msra.mxu0 %v1629_v15  ;;  %1245 = vmatpush3.bf16.msra.mxu1 %v1629_v15 }
  0x1c   :  { %1200 = vmatprep.subr.bf16.mxu0 %v1636_v16  ;;  %1246 = vmatprep.subr.bf16.mxu1 %v1636_v16 }
  0x1f   :  { %1201 = vmatpush3.bf16.msra.mxu0 %v1643_v17  ;;  %1247 = vmatpush3.bf16.msra.mxu1 %v1643_v17 }
  0x20   :  { %1370 = vmatprep.subr.bf16.mxu0 %v1650_v18  ;;  %1278 = vmatprep.subr.bf16.mxu1 %v1534_v0 }
  0x22   :  { %283 = vmatmul.mubr.bf16.vlgmr.msra.gmra.mrb[0].mxu0 %v1434_v19  ;;  %492 = vmatmul.mubr.bf16.vlgmr.msra.gmra.mrb[0].mxu1 %v1437_v20 }
  0x23   :  { %1371 = vmatpush3.bf16.msra.mxu0 %v1650_v18  ;;  %1279 = vmatpush3.bf16.msra.mxu1 %v1539_v1 }
  0x24   :  { %1280 = vmatprep.subr.bf16.mxu1 %v1546_v2  ;;  %290 = vmatprep.mubr.bf16.mxu0 %v1441_v21 }
  0x25   :  { %499 = vmatprep.mubr.bf16.mxu1 %v1443_v22  ;;  %1372 = vmatprep.subr.bf16.mxu0 %v1671_v23 }
  0x27   :  { %1281 = vmatpush3.bf16.msra.mxu1 %v1553_v3  ;;  %1373 = vmatpush3.bf16.msra.mxu0 %v1671_v23 }
  0x28   :  { %1282 = vmatprep.subr.bf16.mxu1 %v1560_v4  ;;  %1382 = vmatprep.subr.bf16.mxu0 %v1650_v18 }
  0x2a   :  { %291 = vmatmul.mubr.bf16.gmra.mrb[4].mxu0 %v1445_v24  ;;  %500 = vmatmul.mubr.bf16.gmra.mrb[4].mxu1 %v1446_v25 }
  0x2b   :  { %1283 = vmatpush3.bf16.msra.mxu1 %v1567_v5  ;;  %298 = vmatprep.mubr.bf16.mxu0 %v1447_v26 }
  0x2c   :  { %1284 = vmatprep.subr.bf16.mxu1 %v1574_v6  ;;  %507 = vmatprep.mubr.bf16.mxu1 %v1449_v27 }
  0x2f   :  { %1285 = vmatpush3.bf16.msra.mxu1 %v1581_v7 }
  0x30   :  { %1286 = vmatprep.subr.bf16.mxu1 %v1588_v8 }
  0x32   :  { %299 = vmatmul.mubr.bf16.gmra.mrb[8].mxu0 %v1451_v30  ;;  %508 = vmatmul.mubr.bf16.gmra.mrb[8].mxu1 %v1453_v31 }
  0x33   :  { %1287 = vmatpush3.bf16.msra.mxu1 %v1595_v9  ;;  %306 = vmatprep.mubr.bf16.mxu0 %v1099_v32 }
  0x34   :  { %1288 = vmatprep.subr.bf16.mxu1 %v1602_v10  ;;  %515 = vmatprep.mubr.bf16.mxu1 %v1133_v33 }
  0x37   :  { %1289 = vmatpush3.bf16.msra.mxu1 %v1615_v13 }
  0x38   :  { %1290 = vmatprep.subr.bf16.mxu1 %v1622_v14 }
  0x3a   :  { %307 = vmatmul.mubr.bf16.gmra.mrb[12].mxu0 %v1098_v34  ;;  %516 = vmatmul.mubr.bf16.gmra.mrb[12].mxu1 %v1132_v35 }
  0x3b   :  { %1291 = vmatpush3.bf16.msra.mxu1 %v1629_v15  ;;  %1374 = vmatprep.mubr.msk.bf16.mxu0 %vm237_vm0, %v1458_v36 }
  0x3c   :  { %1292 = vmatprep.subr.bf16.mxu1 %v1636_v16  ;;  %707 = vmatprep.mubr.bf16.mxu1 %v1461_v37 }
  0x3f   :  { %1293 = vmatpush3.bf16.msra.mxu1 %v1643_v17 }
  0x40   :  { %1324 = vmatprep.subr.bf16.mxu1 %v1534_v0  ;;  %v1490_v0 = vld [vmem:[%s1916_s3 + $0x30] ss:$12 sps:$4 sm:$0xff]  }
  0x42   :  { %1375 = vmatmul.mubr.msk.bf16.vlgmr.msra.gmra.mrb[16].mxu0 %vm237_vm0, %v1462_v39  ;;  %708 = vmatmul.mubr.bf16.vlgmr.msra.gmra.mrb[16].mxu1 %v1459_v38 }
  0x43   :  { %1383 = vmatpush3.bf16.msra.mxu0 %v1650_v18  ;;  %1325 = vmatpush3.bf16.msra.mxu1 %v1539_v1  ;;  %v1491_v1 = vld [vmem:[%s1916_s3 + $0x20] ss:$12 sps:$4 sm:$0xff]  }
  0x44   :  { %1326 = vmatprep.subr.bf16.mxu1 %v1546_v2  ;;  %1378 = vmatprep.mubr.msk.bf16.mxu0 %vm237_vm0, %v1463_v40  ;;  %v1165_v2 = vcombine.high %v822_v63, %v822_v63 }
  0x45   :  { %715 = vmatprep.mubr.bf16.mxu1 %v1464_v41  ;;  %1384 = vmatprep.subr.bf16.mxu0 %v1671_v23 }
  0x47   :  { %1327 = vmatpush3.bf16.msra.mxu1 %v1553_v3  ;;  %1385 = vmatpush3.bf16.msra.mxu0 %v1671_v23  ;;  %v1493_v3 = vld [vmem:[%s1916_s3 + $0x38] ss:$12 sps:$4 sm:$0xff]  }
  0x48   :  { %1328 = vmatprep.subr.bf16.mxu1 %v1560_v4  ;;  %1394 = vmatprep.subr.bf16.mxu0 %v1650_v18  ;;  %v1164_v4 = vcombine.low %v822_v63, %v822_v63 }
  0x4a   :  { %1379 = vmatmul.mubr.msk.bf16.gmra.mrb[20].mxu0 %vm237_vm0, %v1466_v42  ;;  %716 = vmatmul.mubr.bf16.gmra.mrb[20].mxu1 %v1467_v43 }
  0x4b   :  { %1329 = vmatpush3.bf16.msra.mxu1 %v1567_v5  ;;  %1386 = vmatprep.mubr.msk.bf16.mxu0 %vm237_vm0, %v1468_v44  ;;  %v1495_v5 = vld [vmem:[%s1916_s3 + $0x50] ss:$0 sps:$4 sm:$0x11]  }
  0x4c   :  { %1330 = vmatprep.subr.bf16.mxu1 %v1574_v6  ;;  %723 = vmatprep.mubr.bf16.mxu1 %v1469_v45 }
  0x4f   :  { %1331 = vmatpush3.bf16.msra.mxu1 %v1581_v7 }
  0x50   :  { %1332 = vmatprep.subr.bf16.mxu1 %v1588_v8 }
  0x52   :  { %1387 = vmatmul.mubr.msk.bf16.vlgmr.msra.gmra.mrb[24].mxu0 %vm237_vm0, %v1471_v46  ;;  %724 = vmatmul.mubr.bf16.gmra.mrb[24].mxu1 %v1472_v47 }
  0x53   :  { %1395 = vmatpush3.bf16.msra.mxu0 %v1650_v18  ;;  %1333 = vmatpush3.bf16.msra.mxu1 %v1595_v9 }
  0x54   :  { %1334 = vmatprep.subr.bf16.mxu1 %v1602_v10  ;;  %1390 = vmatprep.mubr.msk.bf16.mxu0 %vm237_vm0, %v1473_v49 }
  0x55   :  { %731 = vmatprep.mubr.bf16.mxu1 %v1149_v50  ;;  %1396 = vmatprep.subr.bf16.mxu0 %v1671_v23 }
  0x57   :  { %1335 = vmatpush3.bf16.msra.mxu1 %v1615_v13  ;;  %1397 = vmatpush3.bf16.msra.mxu0 %v1671_v23 }
  0x58   :  { %1336 = vmatprep.subr.bf16.mxu1 %v1622_v14  ;;  %1406 = vmatprep.subr.bf16.mxu0 %v1650_v18 }
  0x5a   :  { %1391 = vmatmul.mubr.msk.bf16.gmra.mrb[28].mxu0 %vm237_vm0, %v1475_v51  ;;  %732 = vmatmul.mubr.bf16.gmra.mrb[28].mxu1 %v1148_v52 }
  0x5b   :  { %1337 = vmatpush3.bf16.msra.mxu1 %v1629_v15  ;;  %1398 = vmatprep.mubr.msk.bf16.mxu0 %vm237_vm0, %v1477_v53 }
  0x5c   :  { %1338 = vmatprep.subr.bf16.mxu1 %v1636_v16  ;;  %923 = vmatprep.mubr.bf16.mxu1 %v1480_v54 }
  0x5f   :  { %1339 = vmatpush3.bf16.msra.mxu1 %v1643_v17 }
  0x62   :  { %1399 = vmatmul.mubr.msk.bf16.vlgmr.msra.gmra.mrb[32].mxu0 %vm237_vm0, %v1481_v56  ;;  %924 = vmatmul.mubr.bf16.vlgmr.msra.gmra.mrb[32].mxu1 %v1478_v55 }
  0x63   :  { %1407 = vmatpush3.bf16.msra.mxu0 %v1650_v18  ;;  %1402 = vmatprep.mubr.msk.bf16.mxu0 %vm237_vm0, %v1482_v57 }
  0x64   :  { %931 = vmatprep.mubr.bf16.mxu1 %v1483_v58  ;;  %1408 = vmatprep.subr.bf16.mxu0 %v1671_v23 }
  0x67   :  { %1409 = vmatpush3.bf16.msra.mxu0 %v1671_v23 }
  0x6a   :  { %1403 = vmatmul.mubr.msk.bf16.gmra.mrb[36].mxu0 %vm237_vm0, %v1485_v59  ;;  %932 = vmatmul.mubr.bf16.gmra.mrb[36].mxu1 %v1486_v60 }
  0x6b   :  { %939 = vmatprep.mubr.bf16.mxu1 %v1487_v61  ;;  %1410 = vmatprep.mubr.msk.bf16.mxu0 %vm237_vm0, %v1489_v62 }
  0x72   :  { %940 = vmatmul.mubr.bf16.gmra.mrb[40].mxu1 %v1490_v0  ;;  %1411 = vmatmul.mubr.msk.bf16.vlgmr.msra.gmra.mrb[40].mxu0 %vm237_vm0, %v1491_v1 }
  0x73   :  { %947 = vmatprep.mubr.bf16.mxu1 %v1165_v2  ;;  %1414 = vmatprep.mubr.msk.bf16.mxu0 %vm237_vm0, %v1493_v3 }
  0x7a   :  { %948 = vmatmul.mubr.bf16.gmra.mrb[44].mxu1 %v1164_v4  ;;  %1415 = vmatmul.mubr.msk.bf16.gmra.mrb[44].mxu0 %vm237_vm0, %v1495_v5 }
  0xf5   :  { %v1202_v6 = vpop.f32.mrb[0].mxu0  ;;  %v1248_v7 = vpop.f32.mrb[0].mxu1 }
  0xf6   :  { %v1203_v8 = vpop.f32.mrb[1].mxu0  ;;  %v1249_v9 = vpop.f32.mrb[1].mxu1 }
  0xf7   :  { %v1204_v10 = vadd.f32 %v1203_v8, %v1202_v6  ;;  %v1849_v11 = vadd.f32 %v1249_v9, %v1248_v7  ;;  %v1205_v12 = vpop.f32.mrb[2].mxu0  ;;  %v1251_v13 = vpop.f32.mrb[2].mxu1 }
  0xf8   :  { %v1206_v14 = vpop.f32.mrb[3].mxu0  ;;  %v1252_v15 = vpop.f32.mrb[3].mxu1 }
  0xf9   :  { %v1207_v16 = vadd.f32 %v1206_v14, %v1205_v12  ;;  %v1851_v17 = vadd.f32 %v1252_v15, %v1251_v13 }
  0xfd   :  { %v1208_v18 = vpop.f32.mrb[4].mxu0  ;;  %v1254_v19 = vpop.f32.mrb[4].mxu1 }
  0xfe   :  { %v1209_v20 = vpop.f32.mrb[5].mxu0  ;;  %v1255_v21 = vpop.f32.mrb[5].mxu1 }
  0xff   :  { %v1210_v22 = vadd.f32 %v1209_v20, %v1208_v18  ;;  %v1256_v23 = vadd.f32 %v1255_v21, %v1254_v19  ;;  %v1211_v24 = vpop.f32.mrb[6].mxu0  ;;  %v1257_v25 = vpop.f32.mrb[6].mxu1 }
 0x100   :  { %v1212_v26 = vpop.f32.mrb[7].mxu0  ;;  %v1258_v27 = vpop.f32.mrb[7].mxu1 }
 0x101   :  { %v1213_v28 = vadd.f32 %v1212_v26, %v1211_v24  ;;  %v1259_v29 = vadd.f32 %v1258_v27, %v1257_v25 }
 0x105   :  { %v1214_v30 = vpop.f32.mrb[8].mxu0  ;;  %v1260_v31 = vpop.f32.mrb[8].mxu1 }
 0x106   :  { %v1215_v32 = vpop.f32.mrb[9].mxu0  ;;  %v1261_v33 = vpop.f32.mrb[9].mxu1 }
 0x107   :  { %v1216_v34 = vadd.f32 %v1215_v32, %v1214_v30  ;;  %v1853_v35 = vadd.f32 %v1261_v33, %v1260_v31  ;;  %v1217_v36 = vpop.f32.mrb[10].mxu0  ;;  %v1263_v37 = vpop.f32.mrb[10].mxu1 }
 0x108   :  { %v1218_v38 = vpop.f32.mrb[11].mxu0  ;;  %v1264_v39 = vpop.f32.mrb[11].mxu1 }
 0x109   :  { %v1219_v40 = vadd.f32 %v1218_v38, %v1217_v36  ;;  %v1855_v41 = vadd.f32 %v1264_v39, %v1263_v37 }
 0x10d   :  { %v1220_v42 = vpop.f32.mrb[12].mxu0  ;;  %v1266_v43 = vpop.f32.mrb[12].mxu1 }
 0x10e   :  { %v1221_v44 = vpop.f32.mrb[13].mxu0  ;;  %v1267_v45 = vpop.f32.mrb[13].mxu1 }
 0x10f   :  { %v1222_v46 = vadd.f32 %v1221_v44, %v1220_v42  ;;  %v1268_v47 = vadd.f32 %v1267_v45, %v1266_v43  ;;  %v1223_v48 = vpop.f32.mrb[14].mxu0  ;;  %v1269_v49 = vpop.f32.mrb[14].mxu1 }
 0x110   :  { %v1224_v50 = vpop.f32.mrb[15].mxu0  ;;  %v1270_v51 = vpop.f32.mrb[15].mxu1 }
 0x115   :  { %v1376_v52 = vpop.f32.mrb[16].mxu0  ;;  %v1294_v53 = vpop.f32.mrb[16].mxu1 }
 0x116   :  { %v1857_v54 = vadd.f32 %v1376_v52, %v1210_v22  ;;  %v348_v55 = vpop.f32.mrb[17].mxu0  ;;  %v1295_v56 = vpop.f32.mrb[17].mxu1 }
 0x117   :  { %v1859_v57 = vadd.f32 %v1204_v10, %v348_v55  ;;  %v1296_v58 = vadd.f32 %v1295_v56, %v1294_v53  ;;  %v1377_v59 = vpop.f32.mrb[18].mxu0  ;;  %v1297_v60 = vpop.f32.mrb[18].mxu1 }
 0x118   :  { %v1861_v61 = vadd.f32 %v1377_v59, %v1213_v28  ;;  %v351_v62 = vpop.f32.mrb[19].mxu0  ;;  %v1298_v63 = vpop.f32.mrb[19].mxu1 }
 0x119   :  { %v1863_v0 = vadd.f32 %v1207_v16, %v351_v62  ;;  %v1299_v1 = vadd.f32 %v1298_v63, %v1297_v60 }
 0x11d   :  { %v1380_v2 = vpop.f32.mrb[20].mxu0  ;;  %v1300_v3 = vpop.f32.mrb[20].mxu1 }
 0x11e   :  { %v1865_v4 = vadd.f32 %v1380_v2, %v1222_v46  ;;  %v364_v5 = vpop.f32.mrb[21].mxu0  ;;  %v1301_v6 = vpop.f32.mrb[21].mxu1 }
 0x11f   :  { %v1867_v7 = vadd.f32 %v1216_v34, %v364_v5  ;;  %v1302_v8 = vadd.f32 %v1301_v6, %v1300_v3  ;;  %v1381_v9 = vpop.f32.mrb[22].mxu0  ;;  %v1303_v10 = vpop.f32.mrb[22].mxu1 }
 0x120   :  { %v367_v12 = vpop.f32.mrb[23].mxu0  ;;  %v1304_v13 = vpop.f32.mrb[23].mxu1 }
 0x121   :  { %v1869_v14 = vadd.f32 %v1219_v40, %v367_v12  ;;  %v1305_v15 = vadd.f32 %v1304_v13, %v1303_v10 }
 0x125   :  { %v1388_v18 = vpop.f32.mrb[24].mxu0  ;;  %v1306_v16 = vpop.f32.mrb[24].mxu1 }
 0x126   :  { %v566_v19 = vadd.f32 %v1388_v18, %v1256_v23  ;;  %v557_v20 = vpop.f32.mrb[25].mxu0  ;;  %v1307_v21 = vpop.f32.mrb[25].mxu1 }
 0x127   :  { %v558_v22 = vadd.f32 %v1849_v11, %v557_v20  ;;  %v1308_v24 = vadd.f32 %v1307_v21, %v1306_v16  ;;  %v1389_v25 = vpop.f32.mrb[26].mxu0  ;;  %v1309_v26 = vpop.f32.mrb[26].mxu1 }
 0x128   :  { %v589_v27 = vmax.f32 %v1857_v54, %v566_v19  ;;  %v569_v28 = vadd.f32 %v1389_v25, %v1259_v29  ;;  %v560_v30 = vpop.f32.mrb[27].mxu0  ;;  %v1310_v31 = vpop.f32.mrb[27].mxu1 }
 0x129   :  { %v587_v32 = vmax.f32 %v1859_v57, %v558_v22  ;;  %v561_v33 = vadd.f32 %v1851_v17, %v560_v30  ;;  %v1311_v34 = vadd.f32 %v1310_v31, %v1309_v26 }
 0x12a   :  { %v590_v36 = vmax.f32 %v1861_v61, %v569_v28 }
 0x12b   :  { %v588_v23 = vmax.f32 %v1863_v0, %v561_v33 }
 0x12d   :  { %v1392_v37 = vpop.f32.mrb[28].mxu0  ;;  %v1312_v38 = vpop.f32.mrb[28].mxu1 }
 0x12e   :  { %v582_v11 = vadd.f32 %v1392_v37, %v1268_v47  ;;  %v573_v39 = vpop.f32.mrb[29].mxu0  ;;  %v1313_v40 = vpop.f32.mrb[29].mxu1 }
 0x12f   :  { %v574_v42 = vadd.f32 %v1853_v35, %v573_v39  ;;  %v1314_v43 = vadd.f32 %v1313_v40, %v1312_v38  ;;  %v1393_v29 = vpop.f32.mrb[30].mxu0  ;;  %v1315_v44 = vpop.f32.mrb[30].mxu1 }
 0x130   :  { %v593_v45 = vmax.f32 %v1865_v4, %v582_v11  ;;  %v576_v46 = vpop.f32.mrb[31].mxu0  ;;  %v1316_v48 = vpop.f32.mrb[31].mxu1 }
 0x131   :  { %v591_v17 = vmax.f32 %v1867_v7, %v574_v42  ;;  %v577_v49 = vadd.f32 %v1855_v41, %v576_v46 }
 0x133   :  { %v592_v50 = vmax.f32 %v1869_v14, %v577_v49 }
 0x135   :  { %v1400_v51 = vpop.f32.mrb[32].mxu0  ;;  %v1340_v52 = vpop.f32.mrb[32].mxu1 }
 0x136   :  { %v782_v47 = vadd.f32 %v1400_v51, %v1302_v8  ;;  %v773_v53 = vpop.f32.mrb[33].mxu0  ;;  %v1341_v54 = vpop.f32.mrb[33].mxu1 }
 0x137   :  { %v774_v55 = vadd.f32 %v1296_v58, %v773_v53  ;;  %v1342_v35 = vadd.f32 %v1341_v54, %v1340_v52  ;;  %v1401_v56 = vpop.f32.mrb[34].mxu0  ;;  %v1343_v57 = vpop.f32.mrb[34].mxu1 }
 0x138   :  { %v805_v59 = vmax.f32 %v589_v27, %v782_v47  ;;  %v785_v60 = vadd.f32 %v1401_v56, %v1305_v15  ;;  %v776_v61 = vpop.f32.mrb[35].mxu0  ;;  %v1344_v62 = vpop.f32.mrb[35].mxu1  ;;  %v1171_v27 = vld [vmem:[%s1917_s5] ss:$0 sm:$0xff] }
 0x139   :  { %v803_v63 = vmax.f32 %v587_v32, %v774_v55  ;;  %v777_v0 = vadd.f32 %v1299_v1, %v776_v61  ;;  %v1345_v2 = vadd.f32 %v1344_v62, %v1343_v57 }
 0x13a   :  { %v806_v3 = vmax.f32 %v590_v36, %v785_v60 }
 0x13b   :  { %v804_v41 = vmax.f32 %v588_v23, %v777_v0 }
 0x13d   :  { %v1404_v4 = vpop.f32.mrb[36].mxu0  ;;  %v1346_v5 = vpop.f32.mrb[36].mxu1 }
 0x13e   :  { %v798_v6 = vadd.f32 %v1404_v4, %v1314_v43  ;;  %v789_v7 = vpop.f32.mrb[37].mxu0  ;;  %v1347_v8 = vpop.f32.mrb[37].mxu1 }
 0x13f   :  { %v790_v9 = vadd.f32 %v1308_v24, %v789_v7  ;;  %v1348_v10 = vadd.f32 %v1347_v8, %v1346_v5  ;;  %v1405_v58 = vpop.f32.mrb[38].mxu0  ;;  %v1349_v12 = vpop.f32.mrb[38].mxu1 }
 0x140   :  { %v809_v13 = vmax.f32 %v593_v45, %v798_v6  ;;  %v792_v14 = vpop.f32.mrb[39].mxu0  ;;  %v1350_v18 = vpop.f32.mrb[39].mxu1 }
 0x141   :  { %v807_v15 = vmax.f32 %v591_v17, %v790_v9  ;;  %v793_v16 = vadd.f32 %v1311_v34, %v792_v14  ;;  %v1351_v19 = vadd.f32 %v1350_v18, %v1349_v12 }
 0x143   :  { %v808_v20 = vmax.f32 %v592_v50, %v793_v16 }
 0x145   :  { %v1352_v1 = vpop.f32.mrb[40].mxu1  ;;  %v1412_v21 = vpop.f32.mrb[40].mxu0 }
 0x146   :  { %v998_v22 = vadd.f32 %v1412_v21, %v1348_v10  ;;  %v1353_v25 = vpop.f32.mrb[41].mxu1  ;;  %v989_v26 = vpop.f32.mrb[41].mxu0 }
 0x147   :  { %v1354_v24 = vadd.f32 %v1353_v25, %v1352_v1  ;;  %v990_v28 = vadd.f32 %v1342_v35, %v989_v26  ;;  %v1355_v30 = vpop.f32.mrb[42].mxu1  ;;  %v1413_v31 = vpop.f32.mrb[42].mxu0 }
 0x148   :  { %v1021_v32 = vmax.f32 %v805_v59, %v998_v22  ;;  %v1001_v33 = vadd.f32 %v1413_v31, %v1351_v19  ;;  %v1356_v36 = vpop.f32.mrb[43].mxu1  ;;  %v992_v23 = vpop.f32.mrb[43].mxu0 }
 0x149   :  { %v1019_v34 = vmax.f32 %v803_v63, %v990_v28  ;;  %v1357_v37 = vadd.f32 %v1356_v36, %v1355_v30  ;;  %v993_v38 = vadd.f32 %v1345_v2, %v992_v23 }
 0x14a   :  { %v1035_v11 = vadd.f32 %v1171_v27, %v1021_v32  ;;  %v1022_v39 = vmax.f32 %v806_v3, %v1001_v33 }
 0x14b   :  { %v1033_v40 = vadd.f32 %v1171_v27, %v1019_v34  ;;  %v1020_v42 = vmax.f32 %v804_v41, %v993_v38 }
 0x14c   :  { %v1042_v43 = vmax.f32 %v1035_v11, 0.0  ;;  %v1036_v29 = vadd.f32 %v1171_v27, %v1022_v39 }
 0x14d   :  { %v1040_v44 = vmax.f32 %v1033_v40, 0.0  ;;  %v1034_v45 = vadd.f32 %v1171_v27, %v1020_v42  ;;  %v1358_v46 = vpop.f32.mrb[44].mxu1  ;;  %v1416_v48 = vpop.f32.mrb[44].mxu0 }
 0x14e   :  { %v1181_v17 = vpack.c.bf16 %v1042_v43, %v1042_v43  ;;  %v1043_v49 = vmax.f32 %v1036_v29, 0.0  ;;  %v1359_v50 = vpop.f32.mrb[45].mxu1  ;;  %v1005_v51 = vpop.f32.mrb[45].mxu0 }
 0x14f   :  { %v1179_v52 = vpack.c.bf16 %v1040_v44, %v1040_v44  ;;  %v1041_v47 = vmax.f32 %v1034_v45, 0.0  ;;  %v1360_v53 = vadd.f32 %v1359_v50, %v1358_v46  ;;  %v1006_v54 = vadd.f32 %v1354_v24, %v1005_v51  ;;  %v1361_v55 = vpop.f32.mrb[46].mxu1  ;;  %v1417_v35 = vpop.f32.mrb[46].mxu0 }
 0x150   :  { %1079 = vst.msk [vmem:[%s1918_s6 + $0x8] sm:$0xf] %vm1076_vm1, %v1181_v17  ;;  %v1182_v56 = vpack.c.bf16 %v1043_v49, %v1043_v49  ;;  %v1362_v57 = vpop.f32.mrb[47].mxu1  ;;  %v1008_v59 = vpop.f32.mrb[47].mxu0 }
 0x151   :  { %1077 = vst.msk [vmem:[%s1918_s6] sm:$0xf] %vm1076_vm1, %v1179_v52  ;;  %v1180_v60 = vpack.c.bf16 %v1041_v47, %v1041_v47  ;;  %v1014_v61 = vadd.f32 %v1416_v48, %v1360_v53  ;;  %v1023_v62 = vmax.f32 %v807_v15, %v1006_v54  ;;  %v1009_v63 = vadd.f32 %v1357_v37, %v1008_v59 }
 0x152   :  { %1080 = vst.msk [vmem:[%s1918_s6 + $0xc] sm:$0xf] %vm1076_vm1, %v1182_v56 }
 0x153   :  { %1078 = vst.msk [vmem:[%s1918_s6 + $0x4] sm:$0xf] %vm1076_vm1, %v1180_v60  ;;  %v1025_v0 = vmax.f32 %v809_v13, %v1014_v61  ;;  %v1037_v2 = vadd.f32 %v1171_v27, %v1023_v62  ;;  %v1024_v3 = vmax.f32 %v808_v20, %v1009_v63 }
 0x155   :  { %v1039_v41 = vadd.f32 %v1171_v27, %v1025_v0  ;;  %v1044_v4 = vmax.f32 %v1037_v2, 0.0  ;;  %v1038_v5 = vadd.f32 %v1171_v27, %v1024_v3 }
 0x157   :  { %v1046_v6 = vmax.f32 %v1039_v41, 0.0  ;;  %v1183_v7 = vpack.c.bf16 %v1044_v4, %v1044_v4  ;;  %v1045_v8 = vmax.f32 %v1038_v5, 0.0 }
 0x159   :  { %v1185_v9 = vpack.c.bf16 %v1046_v6, %v1046_v6  ;;  %1081 = vst.msk [vmem:[%s1918_s6 + $0x10] sm:$0xf] %vm1076_vm1, %v1183_v7  ;;  %v1184_v10 = vpack.c.bf16 %v1045_v8, %v1045_v8 }
 0x15b   :  { %1084 = vst.msk [vmem:[%s1918_s6 + $0x18] sm:$0x1] %vm1083_vm2, %v1185_v9 }
 0x15c   :  { %1082 = vst.msk [vmem:[%s1918_s6 + $0x14] sm:$0xf] %vm1076_vm1, %v1184_v10 }

// kernel: net_forward.5
= control target key start
LH: loop header
LB: loop body
LE: loop exit
PB: predicated region body
PF: predicated region fallthrough
CT: control target
= control target key end

     0   :  { %v237_v27 = vlaneseq  ;;  %v1773_v35 = vmov 1966171168   ;;  %s2173_s0 = inlined_call_operand.vmem [shape: bf16[2,1600], index: 0, kind: input, shape index: {}]   ;;  %s2174_s1 = inlined_call_operand.vmem [shape: bf16[1600,128], index: 1, kind: input, shape index: {}]   ;;  %s2175_s2 = inlined_call_operand.vmem [shape: f32[1,128], index: 2, kind: input, shape index: {}]   ;;  %s2176_s3 = inlined_call_operand.vmem [shape: bf16[128,10], index: 3, kind: input, shape index: {}]   ;;  %s2177_s4 = inlined_call_operand.vmem [shape: f32[1,10], index: 4, kind: input, shape index: {}]   ;;  %s2178_s5 = inlined_call_operand.hbm [shape: f32[2,10], index: 5, kind: output, shape index: {}]  }
   0x1   :  { %v1639_v0 = vld [vmem:[%s2174_s1 + $0x40] sm:$0xff]   ;;  %v1643_v4 = vld [vmem:[%s2174_s1 + $0x48] sm:$0xff]   ;;  %v1647_v8 = vld [vmem:[%s2174_s1 + $0x50] sm:$0xff]   ;;  %v235_v36 = vunpack.c.l.s4 %v1773_v35 }
   0x2   :  { %v1640_v1 = vld [vmem:[%s2174_s1] sm:$0xff]   ;;  %1457 = vmatprep.subr.bf16.mxu0 %v1639_v0  ;;  %v1644_v5 = vld [vmem:[%s2174_s1 + $0x8] sm:$0xff]   ;;  %v1648_v9 = vld [vmem:[%s2174_s1 + $0x10] sm:$0xff]   ;;  %v238_v32 = vshrl.u32 %v237_v27, 7 }
   0x3   :  { %v1641_v2 = vld [vmem:[%s2174_s1 + $0xc0] sm:$0xff]   ;;  %1458 = vmatpush3.bf16.msra.mxu0 %v1640_v1  ;;  %v1645_v6 = vld [vmem:[%s2174_s1 + $0xc8] sm:$0xff]   ;;  %v1649_v10 = vld [vmem:[%s2174_s1 + $0xd0] sm:$0xff]   ;;  %v236_v39 = vunpack.c.0.s8 %v235_v36 }
   0x4   :  { %v1642_v3 = vld [vmem:[%s2174_s1 + $0x80] sm:$0xff]   ;;  %1479 = vmatprep.subr.bf16.mxu1 %v1641_v2  ;;  %1459 = vmatprep.subr.bf16.mxu0 %v1643_v4  ;;  %v1646_v7 = vld [vmem:[%s2174_s1 + $0x88] sm:$0xff]   ;;  %v1650_v11 = vld [vmem:[%s2174_s1 + $0x90] sm:$0xff]  }
   0x5   :  { %1480 = vmatpush3.bf16.msra.mxu1 %v1642_v3  ;;  %v1651_v12 = vld [vmem:[%s2174_s1 + $0x58] sm:$0xff]   ;;  %v1655_v16 = vld [vmem:[%s2174_s1 + $0x60] sm:$0xff]   ;;  %v1659_v20 = vld [vmem:[%s2174_s1 + $0x68] sm:$0xff]   ;;  %v1912_v41 = vsub.s32 %v236_v39, %v238_v32 }
   0x6   :  { %1481 = vmatprep.subr.bf16.mxu1 %v1645_v6  ;;  %v1652_v13 = vld [vmem:[%s2174_s1 + $0x18] sm:$0xff]   ;;  %v1656_v17 = vld [vmem:[%s2174_s1 + $0x20] sm:$0xff]   ;;  %v1660_v21 = vld [vmem:[%s2174_s1 + $0x28] sm:$0xff]  }
   0x7   :  { %1460 = vmatpush3.bf16.msra.mxu0 %v1644_v5  ;;  %v1653_v14 = vld [vmem:[%s2174_s1 + $0xd8] sm:$0xff]   ;;  %v1657_v18 = vld [vmem:[%s2174_s1 + $0xe0] sm:$0xff]   ;;  %v1661_v22 = vld [vmem:[%s2174_s1 + $0xe8] sm:$0xff]  }
   0x8   :  { %1461 = vmatprep.subr.bf16.mxu0 %v1647_v8  ;;  %v1654_v15 = vld [vmem:[%s2174_s1 + $0x98] sm:$0xff]   ;;  %v1658_v19 = vld [vmem:[%s2174_s1 + $0xa0] sm:$0xff]   ;;  %v1662_v23 = vld [vmem:[%s2174_s1 + $0xa8] sm:$0xff]  }
   0x9   :  { %1482 = vmatpush3.bf16.msra.mxu1 %v1646_v7  ;;  %v1663_v24 = vld [vmem:[%s2174_s1 + $0x70] sm:$0xff]   ;;  %v1667_v29 = vld [vmem:[%s2174_s1 + $0x78] sm:$0xff]   ;;  %v22_v33 = vld [vmem:[%s2173_s0] sm:$0xff] }
   0xa   :  { %1483 = vmatprep.subr.bf16.mxu1 %v1649_v10  ;;  %v1664_v25 = vld [vmem:[%s2174_s1 + $0x30] sm:$0xff]   ;;  %v1668_v30 = vld [vmem:[%s2174_s1 + $0x38] sm:$0xff]   ;;  %v1672_v37 = vld [vmem:[%s2174_s1 + $0x140] sm:$0xff]   ;;  %v233_v38 = vcombine.high %v22_v33, %v22_v33  ;;  %v240_v42 = vrot.slane %v22_v33, %v1912_v41 }
   0xb   :  { %1462 = vmatpush3.bf16.msra.mxu0 %v1648_v9  ;;  %v1665_v26 = vld [vmem:[%s2174_s1 + $0xf0] sm:$0xff]   ;;  %v1669_v31 = vld [vmem:[%s2174_s1 + $0xf8] sm:$0xff]   ;;  %v1674_v40 = vld [vmem:[%s2174_s1 + $0x1c0] sm:$0xff]  }
   0xc   :  { %1463 = vmatprep.subr.bf16.mxu0 %v1651_v12  ;;  %v1666_v28 = vld [vmem:[%s2174_s1 + $0xb0] sm:$0xff]   ;;  %v1671_v34 = vld [vmem:[%s2174_s1 + $0xb8] sm:$0xff]   ;;  %v1916_v43 = vrot.slane %v233_v38, %v1912_v41  ;;  %v248_v44 = vcombine.high %v240_v42, %v240_v42  ;;  %v256_v45 = vrot.slane %v240_v42, %v1912_v41  ;;  %v1673_v47 = vld [vmem:[%s2174_s1 + $0x100] sm:$0xff]  }
   0xd   :  { %1484 = vmatpush3.bf16.msra.mxu1 %v1650_v11  ;;  %v1675_v49 = vld [vmem:[%s2174_s1 + $0x180] sm:$0xff]   ;;  %v1676_v52 = vld [vmem:[%s2174_s1 + $0x148] sm:$0xff]   ;;  %v1680_v58 = vld [vmem:[%s2174_s1 + $0x150] sm:$0xff]  }
   0xe   :  { %1485 = vmatprep.subr.bf16.mxu1 %v1653_v14  ;;  %v249_v46 = vcombine.high %v1916_v43, %v1916_v43  ;;  %v270_v48 = vrot.slane %v248_v44, %v1912_v41  ;;  %v278_v51 = vcombine.high %v256_v45, %v256_v45  ;;  %v1677_v54 = vld [vmem:[%s2174_s1 + $0x108] sm:$0xff]   ;;  %v1681_v59 = vld [vmem:[%s2174_s1 + $0x110] sm:$0xff]   ;;  %v1684_v62 = vld [vmem:[%s2174_s1 + $0x158] sm:$0xff]  }
   0xf   :  { %1464 = vmatpush3.bf16.msra.mxu0 %v1652_v13  ;;  %v1678_v55 = vld [vmem:[%s2174_s1 + $0x1c8] sm:$0xff]   ;;  %v1682_v60 = vld [vmem:[%s2174_s1 + $0x1d0] sm:$0xff]   ;;  %v1685_v63 = vld [vmem:[%s2174_s1 + $0x118] sm:$0xff]  }
  0x10   :  { %1465 = vmatprep.subr.bf16.mxu0 %v1655_v16  ;;  %v277_v50 = vrot.slane %v249_v46, %v1912_v41  ;;  %969 = vmatprep.mubr.bf16.mxu0 %v270_v48  ;;  %v280_v53 = vcombine.high %v270_v48, %v270_v48  ;;  %v1679_v57 = vld [vmem:[%s2174_s1 + $0x188] sm:$0xff]   ;;  %v1683_v61 = vld [vmem:[%s2174_s1 + $0x190] sm:$0xff]   ;;  %v1686_v0 = vld [vmem:[%s2174_s1 + $0x1d8] sm:$0xff]  }
  0x11   :  { %1486 = vmatpush3.bf16.msra.mxu1 %v1654_v15  ;;  %v1687_v1 = vld [vmem:[%s2174_s1 + $0x198] sm:$0xff]   ;;  %v1688_v2 = vld [vmem:[%s2174_s1 + $0x160] sm:$0xff]   ;;  %v1692_v6 = vld [vmem:[%s2174_s1 + $0x168] sm:$0xff]  }
  0x12   :  { %1487 = vmatprep.subr.bf16.mxu1 %v1657_v18  ;;  %v281_v56 = vcombine.high %v277_v50, %v277_v50  ;;  %1009 = vmatprep.mubr.bf16.mxu1 %v280_v53  ;;  %v1689_v3 = vld [vmem:[%s2174_s1 + $0x120] sm:$0xff]   ;;  %v1693_v7 = vld [vmem:[%s2174_s1 + $0x128] sm:$0xff]   ;;  %v1696_v10 = vld [vmem:[%s2174_s1 + $0x170] sm:$0xff]   ;;  %v263_v18 = vrot.slane %v1916_v43, %v1912_v41 }
  0x13   :  { %1466 = vmatpush3.bf16.msra.mxu0 %v1656_v17  ;;  %v1690_v4 = vld [vmem:[%s2174_s1 + $0x1e0] sm:$0xff]   ;;  %v1694_v8 = vld [vmem:[%s2174_s1 + $0x1e8] sm:$0xff]   ;;  %v1697_v11 = vld [vmem:[%s2174_s1 + $0x130] sm:$0xff]  }
  0x14   :  { %1467 = vmatprep.subr.bf16.mxu0 %v1659_v20  ;;  %v1691_v5 = vld [vmem:[%s2174_s1 + $0x1a0] sm:$0xff]   ;;  %v1695_v9 = vld [vmem:[%s2174_s1 + $0x1a8] sm:$0xff]   ;;  %v1698_v12 = vld [vmem:[%s2174_s1 + $0x1f0] sm:$0xff]  }
  0x15   :  { %1488 = vmatpush3.bf16.msra.mxu1 %v1658_v19  ;;  %v1699_v13 = vld [vmem:[%s2174_s1 + $0x1b0] sm:$0xff]   ;;  %v1700_v14 = vld [vmem:[%s2174_s1 + $0x178] sm:$0xff]   ;;  %v1704_v19 = vld [vmem:[%s2174_s1 + $0x240] sm:$0xff]  }
  0x16   :  { %1489 = vmatprep.subr.bf16.mxu1 %v1661_v22  ;;  %v1701_v15 = vld [vmem:[%s2174_s1 + $0x138] sm:$0xff]   ;;  %v1705_v20 = vld [vmem:[%s2174_s1 + $0x200] sm:$0xff]   ;;  %v1711_v27 = vld [vmem:[%s2174_s1 + $0x288] sm:$0xff]  }
  0x17   :  { %1468 = vmatpush3.bf16.msra.mxu0 %v1660_v21  ;;  %v1702_v16 = vld [vmem:[%s2174_s1 + $0x1f8] sm:$0xff]   ;;  %v1706_v21 = vld [vmem:[%s2174_s1 + $0x2c0] sm:$0xff]   ;;  %v1725_v42 = vld [vmem:[%s2174_s1 + $0x228] sm:$0xff]  }
  0x18   :  { %1469 = vmatprep.subr.bf16.mxu0 %v1663_v24  ;;  %v1703_v17 = vld [vmem:[%s2174_s1 + $0x1b8] sm:$0xff]   ;;  %v1707_v22 = vld [vmem:[%s2174_s1 + $0x280] sm:$0xff]   ;;  %v1708_v24 = vld [vmem:[%s2174_s1 + $0x248] sm:$0xff]  }
  0x19   :  { %1490 = vmatpush3.bf16.msra.mxu1 %v1662_v23  ;;  %v279_v23 = vcombine.high %v263_v18, %v263_v18  ;;  %v1716_v32 = vld [vmem:[%s2174_s1 + $0x258] sm:$0xff]   ;;  %v1720_v36 = vld [vmem:[%s2174_s1 + $0x260] sm:$0xff]   ;;  %v1726_v43 = vld [vmem:[%s2174_s1 + $0x2e8] sm:$0xff]  }
  0x1a   :  { %1491 = vmatprep.subr.bf16.mxu1 %v1665_v26  ;;  %v1710_v26 = vld [vmem:[%s2174_s1 + $0x2c8] sm:$0xff]   ;;  %v1717_v33 = vld [vmem:[%s2174_s1 + $0x218] sm:$0xff]   ;;  %v1722_v38 = vld [vmem:[%s2174_s1 + $0x2e0] sm:$0xff]  }
  0x1b   :  { %1470 = vmatpush3.bf16.msra.mxu0 %v1664_v25  ;;  %v1709_v25 = vld [vmem:[%s2174_s1 + $0x208] sm:$0xff]   ;;  %v1719_v35 = vld [vmem:[%s2174_s1 + $0x298] sm:$0xff]   ;;  %v1723_v39 = vld [vmem:[%s2174_s1 + $0x2a0] sm:$0xff]  }
  0x1c   :  { %1471 = vmatprep.subr.bf16.mxu0 %v1667_v29  ;;  %v1713_v29 = vld [vmem:[%s2174_s1 + $0x210] sm:$0xff]   ;;  %v1727_v44 = vld [vmem:[%s2174_s1 + $0x2a8] sm:$0xff]   ;;  %v1733_v53 = vld [vmem:[%s2174_s1 + $0x238] sm:$0xff]  }
  0x1d   :  { %1492 = vmatpush3.bf16.msra.mxu1 %v1666_v28  ;;  %v1712_v28 = vld [vmem:[%s2174_s1 + $0x250] sm:$0xff]   ;;  %v23_v46 = vld [vmem:[%s2173_s0 + $0x8] sm:$0x1f] }
  0x1e   :  { %1493 = vmatprep.subr.bf16.mxu1 %v1669_v31  ;;  %v1715_v31 = vld [vmem:[%s2174_s1 + $0x290] sm:$0xff]   ;;  %v289_v48 = vrot.slane %v23_v46, %v1912_v41 }
  0x1f   :  { %1472 = vmatpush3.bf16.msra.mxu0 %v1668_v30  ;;  %v1714_v30 = vld [vmem:[%s2174_s1 + $0x2d0] sm:$0xff]  }
  0x20   :  { %1501 = vmatprep.subr.bf16.mxu0 %v1672_v37  ;;  %v1721_v37 = vld [vmem:[%s2174_s1 + $0x220] sm:$0xff]  }
  0x21   :  { %1494 = vmatpush3.bf16.msra.mxu1 %v1671_v34  ;;  %v1718_v34 = vld [vmem:[%s2174_s1 + $0x2d8] sm:$0xff]  }
  0x22   :  { %1523 = vmatprep.subr.bf16.mxu1 %v1674_v40  ;;  %970 = vmatmul.mubr.bf16.vlgmr.msra.gmra.mrb[0].mxu0 %v256_v45  ;;  %v1724_v40 = vld [vmem:[%s2174_s1 + $0x268] sm:$0xff]   ;;  %v1728_v45 = vld [vmem:[%s2174_s1 + $0x270] sm:$0xff]  }
  0x23   :  { %1502 = vmatpush3.bf16.msra.mxu0 %v1673_v47  ;;  %1049 = vmatprep.mubr.bf16.mxu0 %v277_v50  ;;  %v1729_v47 = vld [vmem:[%s2174_s1 + $0x230] sm:$0xff]  }
  0x24   :  { %1010 = vmatmul.mubr.bf16.vlgmr.msra.gmra.mrb[0].mxu1 %v278_v51  ;;  %1503 = vmatprep.subr.bf16.mxu0 %v1676_v52  ;;  %v1731_v50 = vld [vmem:[%s2174_s1 + $0x2b0] sm:$0xff]   ;;  %v297_v51 = vcombine.high %v289_v48, %v289_v48  ;;  %v1732_v52 = vld [vmem:[%s2174_s1 + $0x278] sm:$0xff]  }
  0x25   :  { %1524 = vmatpush3.bf16.msra.mxu1 %v1675_v49  ;;  %1089 = vmatprep.mubr.bf16.mxu1 %v281_v56  ;;  %v1730_v49 = vld [vmem:[%s2174_s1 + $0x2f0] sm:$0xff]   ;;  %v1736_v56 = vld [vmem:[%s2174_s1 + $0x2b8] sm:$0xff]  }
  0x26   :  { %1525 = vmatprep.subr.bf16.mxu1 %v1678_v55  ;;  %v318_v55 = vrot.slane %v297_v51, %v1912_v41 }
  0x27   :  { %1504 = vmatpush3.bf16.msra.mxu0 %v1677_v54  ;;  %v1734_v54 = vld [vmem:[%s2174_s1 + $0x2f8] sm:$0xff]  }
  0x28   :  { %1505 = vmatprep.subr.bf16.mxu0 %v1680_v58  ;;  %v304_v58 = vrot.slane %v289_v48, %v1912_v41 }
  0x29   :  { %1526 = vmatpush3.bf16.msra.mxu1 %v1679_v57  ;;  %v320_v57 = vcombine.high %v318_v55, %v318_v55 }
  0x2a   :  { %1527 = vmatprep.subr.bf16.mxu1 %v1682_v60 }
  0x2b   :  { %1506 = vmatpush3.bf16.msra.mxu0 %v1681_v59  ;;  %v1737_v59 = vld [vmem:[%s2174_s1 + $0x300] sm:$0xff]  }
  0x2c   :  { %1507 = vmatprep.subr.bf16.mxu0 %v1684_v62 }
  0x2d   :  { %1528 = vmatpush3.bf16.msra.mxu1 %v1683_v61 }
  0x2e   :  { %1529 = vmatprep.subr.bf16.mxu1 %v1686_v0 }
  0x2f   :  { %1508 = vmatpush3.bf16.msra.mxu0 %v1685_v63 }
  0x30   :  { %1509 = vmatprep.subr.bf16.mxu0 %v1688_v2 }
  0x31   :  { %1530 = vmatpush3.bf16.msra.mxu1 %v1687_v1 }
  0x32   :  { %1531 = vmatprep.subr.bf16.mxu1 %v1690_v4 }
  0x33   :  { %1510 = vmatpush3.bf16.msra.mxu0 %v1689_v3 }
  0x34   :  { %1511 = vmatprep.subr.bf16.mxu0 %v1692_v6 }
  0x35   :  { %1532 = vmatpush3.bf16.msra.mxu1 %v1691_v5 }
  0x36   :  { %1533 = vmatprep.subr.bf16.mxu1 %v1694_v8 }
  0x37   :  { %1512 = vmatpush3.bf16.msra.mxu0 %v1693_v7 }
  0x38   :  { %1513 = vmatprep.subr.bf16.mxu0 %v1696_v10 }
  0x39   :  { %1534 = vmatpush3.bf16.msra.mxu1 %v1695_v9 }
  0x3a   :  { %1535 = vmatprep.subr.bf16.mxu1 %v1698_v12 }
  0x3b   :  { %1514 = vmatpush3.bf16.msra.mxu0 %v1697_v11 }
  0x3c   :  { %1515 = vmatprep.subr.bf16.mxu0 %v1700_v14 }
  0x3d   :  { %1536 = vmatpush3.bf16.msra.mxu1 %v1699_v13 }
  0x3e   :  { %1537 = vmatprep.subr.bf16.mxu1 %v1702_v16 }
  0x3f   :  { %1516 = vmatpush3.bf16.msra.mxu0 %v1701_v15 }
  0x40   :  { %1545 = vmatprep.subr.bf16.mxu0 %v1704_v19 }
  0x41   :  { %1538 = vmatpush3.bf16.msra.mxu1 %v1703_v17 }
  0x42   :  { %1050 = vmatmul.mubr.bf16.vlgmr.msra.gmra.mrb[4].mxu0 %v263_v18  ;;  %1567 = vmatprep.subr.bf16.mxu1 %v1706_v21 }
  0x43   :  { %1546 = vmatpush3.bf16.msra.mxu0 %v1705_v20  ;;  %1129 = vmatprep.mubr.bf16.mxu0 %v318_v55 }
  0x44   :  { %1090 = vmatmul.mubr.bf16.vlgmr.msra.gmra.mrb[4].mxu1 %v279_v23  ;;  %1547 = vmatprep.subr.bf16.mxu0 %v1708_v24 }
  0x45   :  { %1568 = vmatpush3.bf16.msra.mxu1 %v1707_v22  ;;  %1169 = vmatprep.mubr.bf16.mxu1 %v320_v57 }
  0x46   :  { %1569 = vmatprep.subr.bf16.mxu1 %v1710_v26 }
  0x47   :  { %1548 = vmatpush3.bf16.msra.mxu0 %v1709_v25 }
  0x48   :  { %1549 = vmatprep.subr.bf16.mxu0 %v1712_v28 }
  0x49   :  { %1570 = vmatpush3.bf16.msra.mxu1 %v1711_v27 }
  0x4a   :  { %1571 = vmatprep.subr.bf16.mxu1 %v1714_v30 }
  0x4b   :  { %1550 = vmatpush3.bf16.msra.mxu0 %v1713_v29 }
  0x4c   :  { %1551 = vmatprep.subr.bf16.mxu0 %v1716_v32 }
  0x4d   :  { %1572 = vmatpush3.bf16.msra.mxu1 %v1715_v31 }
  0x4e   :  { %1573 = vmatprep.subr.bf16.mxu1 %v1718_v34 }
  0x4f   :  { %1552 = vmatpush3.bf16.msra.mxu0 %v1717_v33 }
  0x50   :  { %1553 = vmatprep.subr.bf16.mxu0 %v1720_v36 }
  0x51   :  { %1574 = vmatpush3.bf16.msra.mxu1 %v1719_v35 }
  0x52   :  { %1575 = vmatprep.subr.bf16.mxu1 %v1722_v38 }
  0x53   :  { %1554 = vmatpush3.bf16.msra.mxu0 %v1721_v37 }
  0x54   :  { %1555 = vmatprep.subr.bf16.mxu0 %v1724_v40 }
  0x55   :  { %1576 = vmatpush3.bf16.msra.mxu1 %v1723_v39 }
  0x56   :  { %1577 = vmatprep.subr.bf16.mxu1 %v1726_v43 }
  0x57   :  { %1556 = vmatpush3.bf16.msra.mxu0 %v1725_v42 }
  0x58   :  { %1557 = vmatprep.subr.bf16.mxu0 %v1728_v45 }
  0x59   :  { %1578 = vmatpush3.bf16.msra.mxu1 %v1727_v44 }
  0x5a   :  { %1579 = vmatprep.subr.bf16.mxu1 %v1730_v49 }
  0x5b   :  { %1558 = vmatpush3.bf16.msra.mxu0 %v1729_v47 }
  0x5c   :  { %1559 = vmatprep.subr.bf16.mxu0 %v1732_v52 }
  0x5d   :  { %1580 = vmatpush3.bf16.msra.mxu1 %v1731_v50 }
  0x5e   :  { %1581 = vmatprep.subr.bf16.mxu1 %v1734_v54 }
  0x5f   :  { %1560 = vmatpush3.bf16.msra.mxu0 %v1733_v53 }
  0x60   :  { %10 = vsyncpa [#allocation3], 0  ;;  %v1774_v60 = vmov 0.0   ;;  %v319_v61 = vcombine.high %v304_v58, %v304_v58  ;;  %v1738_v62 = vld [vmem:[%s2174_s1 + $0x308] sm:$0xff]   ;;  %vm1775_vm0 = vmmov 0   ;;  %v282_v63 = vcombine.high %v23_v46, %v23_v46  ;;  %v1739_v0 = vld [vmem:[%s2174_s1 + $0x310] sm:$0xff]  }
  0x61   :  { %1603 = vmatprep.subr.bf16.mxu0 %v1774_v60  ;;  %1582 = vmatpush3.bf16.msra.mxu1 %v1736_v56  ;;  %v1740_v2 = vld [vmem:[%s2174_s1 + $0x318] sm:$0xff]   ;;  %vm933_vm1 = vcmask 523264   ;;  %v1741_v4 = vld [vmem:[%s2176_s3] sm:$0xff]   ;;  %v1742_v5 = vld [vmem:[%s2176_s3 + $0x8] sm:$0xff]   ;;  %s1776_s12 = smov [#allocation2]   ;;  %vm1330_vm2 = vcmask 74752  }
  0x62   :  { %1130 = vmatmul.mubr.bf16.vlgmr.msra.gmra.mrb[8].mxu0 %v304_v58  ;;  %1615 = vmatprep.subr.bf16.mxu1 %v1774_v60  ;;  %v296_v1 = vrot.slane %v282_v63, %v1912_v41  ;;  %v1743_v6 = vld [vmem:[%s2176_s3 + $0x10] sm:$0xff]   ;;  %v1745_v7 = vld [vmem:[%s2176_s3 + $0x20] sm:$0xff]   ;;  %v1746_v8 = vld [vmem:[%s2176_s3 + $0x28] sm:$0xff]   ;;  %s1338_s13 = sshll.u32 %s1776_s12, 4  ;;  %s1339_s13 = int_to_ptr.vmem [resolvable:$true] %s1338_s13 }
  0x63   :  { %1604 = vmatpush3.bf16.msra.mxu0 %v1737_v59  ;;  %1611 = vmatprep.mubr.msk.bf16.mxu0 %vm1775_vm0, %v1774_v60  ;;  %v1747_v9 = vld [vmem:[%s2176_s3 + $0x30] sm:$0xff]   ;;  %v1748_v10 = vld [vmem:[%s2176_s3 + $0x38] sm:$0xff]   ;;  %v1346_v12 = vld [vmem:[%s2175_s2] ss:$0 sm:$0xff]  ;;  %s1749_s14 = scalar_lea.vmem %s1339_s13, 32  ;;  %p1754_p1 = scmp.lt.s32.totalorder %s1339_s13, %s1339_s13 }
  0x64   :  { %1170 = vmatmul.mubr.bf16.vlgmr.msra.gmra.mrb[8].mxu1 %v319_v61  ;;  %1605 = vmatprep.subr.bf16.mxu0 %v1774_v60  ;;  %v311_v3 = vrot.slane %v296_v1, %v1912_v41  ;;  %v1744_v41 = vld [vmem:[%s2176_s3 + $0x18] sm:$0xff]   ;;  %v1448_v56 = vld [vmem:[%s2177_s4] ss:$0 sm:$0xff]  ;;  %p1750_p0 = scmp.ne.s32.totalorder %s1339_s13, %s1749_s14  ;;  %p1755_p2 = scmp.lt.s32.totalorder %s1749_s14, %s1749_s14 }
  0x65   :  { %1631 = vmatprep.mubr.msk.bf16.mxu1 %vm1775_vm0, %v1774_v60  ;;  %1616 = vmatpush3.bf16.msra.mxu1 %v1741_v4 }
  0x66   :  { %1617 = vmatprep.subr.bf16.mxu1 %v1774_v60  ;;  %p1756_p3 = por %p1755_p2, %p1754_p1 }
  0x67   :  { %1606 = vmatpush3.bf16.msra.mxu0 %v1738_v62 }
  0x68   :  { %1607 = vmatprep.subr.bf16.mxu0 %v1774_v60  ;;  %p1757_p4 = pnand %p1756_p3, %p1750_p0 }
  0x69   :  { %1618 = vmatpush3.bf16.msra.mxu1 %v1742_v5 }
  0x6a   :  { %1619 = vmatprep.subr.bf16.mxu1 %v1774_v60 }
  0x6b   :  { %1608 = vmatpush3.bf16.msra.mxu0 %v1739_v0 }
  0x6c   :  { %1609 = vmatprep.subr.bf16.mxu0 %v1774_v60 }
  0x6d   :  { %1620 = vmatpush3.bf16.msra.mxu1 %v1743_v6 }
  0x6e   :  { %1621 = vmatprep.subr.bf16.mxu1 %v1774_v60 }
  0x6f   :  { %1610 = vmatpush3.bf16.msra.mxu0 %v1740_v2 }
  0x71   :  { %1622 = vmatpush3.bf16.msra.mxu1 %v1744_v41 }
  0x72   :  { %1612 = vmatmul.mubr.msk.bf16.vlgmr.msra.gmra.mrb[12].mxu0 %vm933_vm1, %v311_v3  ;;  %1623 = vmatprep.subr.bf16.mxu1 %v1774_v60 }
  0x75   :  { %1624 = vmatpush3.bf16.msra.mxu1 %v1745_v7 }
  0x76   :  { %1625 = vmatprep.subr.bf16.mxu1 %v1774_v60 }
  0x79   :  { %1626 = vmatpush3.bf16.msra.mxu1 %v1746_v8 }
  0x7a   :  { %1627 = vmatprep.subr.bf16.mxu1 %v1774_v60 }
  0x7d   :  { %1628 = vmatpush3.bf16.msra.mxu1 %v1747_v9 }
  0x7e   :  { %1629 = vmatprep.subr.bf16.mxu1 %v1774_v60 }
  0x81   :  { %1630 = vmatpush3.bf16.msra.mxu1 %v1748_v10 }
  0xf5   :  { %v1473_v11 = vpop.f32.mrb[0].mxu0 }
  0xf6   :  { %v1474_v13 = vpop.f32.mrb[1].mxu0 }
  0xf7   :  { %v1475_v14 = vadd.f32 %v1474_v13, %v1473_v11  ;;  %v1476_v15 = vpop.f32.mrb[2].mxu0  ;;  %v1495_v16 = vpop.f32.mrb[0].mxu1 }
  0xf8   :  { %v1477_v17 = vpop.f32.mrb[3].mxu0  ;;  %v1496_v18 = vpop.f32.mrb[1].mxu1 }
  0xf9   :  { %v972_v19 = vadd.f32 %v1475_v14, %v1346_v12  ;;  %v1497_v20 = vadd.f32 %v1496_v18, %v1495_v16  ;;  %v1498_v21 = vpop.f32.mrb[2].mxu1 }
  0xfa   :  { %v1499_v22 = vpop.f32.mrb[3].mxu1 }
  0xfb   :  { %v1012_v23 = vadd.f32 %v1497_v20, %v972_v19 }
 0x115   :  { %v1517_v24 = vpop.f32.mrb[4].mxu0 }
 0x116   :  { %v1518_v25 = vpop.f32.mrb[5].mxu0 }
 0x117   :  { %v1519_v26 = vadd.f32 %v1518_v25, %v1517_v24  ;;  %v1520_v27 = vpop.f32.mrb[6].mxu0  ;;  %v1539_v28 = vpop.f32.mrb[4].mxu1 }
 0x118   :  { %v1521_v29 = vpop.f32.mrb[7].mxu0  ;;  %v1540_v30 = vpop.f32.mrb[5].mxu1 }
 0x119   :  { %v1052_v31 = vadd.f32 %v1519_v26, %v1012_v23  ;;  %v1541_v32 = vadd.f32 %v1540_v30, %v1539_v28  ;;  %v1542_v33 = vpop.f32.mrb[6].mxu1 }
 0x11a   :  { %v1543_v34 = vpop.f32.mrb[7].mxu1 }
 0x11b   :  { %v1092_v35 = vadd.f32 %v1541_v32, %v1052_v31 }
 0x135   :  { %v1561_v36 = vpop.f32.mrb[8].mxu0 }
 0x136   :  { %v1562_v37 = vpop.f32.mrb[9].mxu0 }
 0x137   :  { %v1563_v38 = vadd.f32 %v1562_v37, %v1561_v36  ;;  %v1564_v39 = vpop.f32.mrb[10].mxu0  ;;  %v1583_v40 = vpop.f32.mrb[8].mxu1 }
 0x138   :  { %v1565_v42 = vpop.f32.mrb[11].mxu0  ;;  %v1584_v43 = vpop.f32.mrb[9].mxu1 }
 0x139   :  { %v1132_v44 = vadd.f32 %v1563_v38, %v1092_v35  ;;  %v1585_v45 = vadd.f32 %v1584_v43, %v1583_v40  ;;  %v1586_v46 = vpop.f32.mrb[10].mxu1 }
 0x13a   :  { %v1587_v47 = vpop.f32.mrb[11].mxu1 }
 0x13b   :  { %v1172_v48 = vadd.f32 %v1585_v45, %v1132_v44 }
 0x145   :  { %v1211_v49 = vpop.f32.mrb[12].mxu0 }
 0x146   :  { %v1212_v50 = vadd.f32 %v1211_v49, %v1172_v48  ;;  %v1613_v51 = vpop.f32.mrb[13].mxu0 }
 0x147   :  { %v1214_v52 = vpop.f32.mrb[14].mxu0 }
 0x148   :  { %v1217_v53 = vmax.f32 %v1212_v50, 0.0  ;;  %v1614_v54 = vpop.f32.mrb[15].mxu0 }
 0x14a   :  { %v1218_v55 = vpack.c.bf16 %v1217_v53, %v1217_v53 }
 0x14c   :  { %1632 = vmatmul.mubr.bf16.vlgmr.msra.gmra.mrb[12].mxu1 %v1218_v55 }
 0x21f   :  { %v1324_v57 = vpop.f32.mrb[12].mxu1 }
 0x220   :  { %v1325_v58 = vadd.f32 %v1448_v56, %v1324_v57  ;;  %v1633_v59 = vpop.f32.mrb[13].mxu1 }
 0x221   :  { %v1327_v60 = vpop.f32.mrb[14].mxu1 }
 0x222   :  { %v1634_v61 = vpop.f32.mrb[15].mxu1  ;;  %1331 = vst.msk [vmem:[#allocation2] sm:$0x3] %vm1330_vm2, %v1325_v58 }
 0x223   :  { %1760 = shalt.err (!%p1757_p4)
}
 0x224   :  { %s1761_s4 = scalar_lea.hbm %s2178_s5, 32 }
 0x225   :  { %p1762_p5 = scmp.ne.s32.totalorder %s2178_s5, %s1761_s4  ;;  %p1765_p6 = scmp.lt.u32.totalorder %s1761_s4, %s2178_s5 }
 0x227   :  { %p1767_p7 = pnand %p1765_p6, %p1762_p5 }
 0x229   :  { %1770 = shalt.err (!%p1767_p7)
}
 0x22a   :  { %1341 = dma.vmem_to_hbm [thread:$0]  %s1339_s13, 32, %s2178_s5, [#allocation3]  }
 0x22b   :  { %1771 = dma.done.wait [#allocation3], 32  }
 0x22c   :  { %1772 = vsyncadd [#allocation3], 4294967264 }
 0x22d   :  { %1345 = vsyncpa [#allocation3], 1 }

</bundles_post_ra>
